<compile_context>
chip_gen: v5e
topology: v5e:2x2
jax: 0.10.0
libtpu: 0.0.40
codegen_flags: <defaults>
</compile_context>

<pallas_src>
import jax
import jax.numpy as jnp
from jax.experimental import pallas as pl
from jax.experimental.pallas import tpu as pltpu

EPS = 1e-6


# -----------------------------------------------------------------------------
# Kernels
# -----------------------------------------------------------------------------
def _cam_kernel_nchw(x_ref, feb_ref, w_ref, g_ref, b_ref, o_ref):
    """Channels-first tile: 1x1 conv + (mean-folded) LayerNorm over channels.

    x_ref:   (1, D, TP)     image-embedding tile (input dtype; cast in-kernel)
    feb_ref: (1, D_out, 1)  per-batch, mean-centered focal contribution (f32)
    w_ref:   (D_out, D)     mean-centered conv weight (compute dtype)
    g_ref:   (D_out, 1)     LayerNorm2d weight (f32)
    b_ref:   (D_out, 1)     LayerNorm2d bias (f32)
    o_ref:   (1, D_out, TP)
    """
    x = x_ref[0].astype(w_ref.dtype)              # VPU cast, hidden under the MXU
    y = jnp.dot(w_ref[...], x, preferred_element_type=jnp.float32)   # (D_out, TP)
    y = y + feb_ref[0]
    # W / focal-bias are centered over channels in the wrapper => mean_c(y) == 0,
    # so the LayerNorm only needs the (biased) second moment.
    var = jnp.sum(y * y, axis=0, keepdims=True) * (1.0 / y.shape[0])  # (1, TP)
    inv = jax.lax.rsqrt(var + EPS)
    o_ref[0] = (y * inv * g_ref[...] + b_ref[...]).astype(o_ref.dtype)


def _cam_kernel_bpc(x_ref, feb_ref, w_ref, g_ref, b_ref, o_ref):
    """Channels-last tile variant.

    x_ref: (1, TP, D), feb_ref: (1, 1, D_out), w_ref: (D, D_out),
    g_ref / b_ref: (1, D_out), o_ref: (1, TP, D_out).
    """
    x = x_ref[0].astype(w_ref.dtype)
    y = jnp.dot(x, w_ref[...], preferred_element_type=jnp.float32)    # (TP, D_out)
    y = y + feb_ref[0]
    var = jnp.sum(y * y, axis=-1, keepdims=True) * (1.0 / y.shape[-1])
    inv = jax.lax.rsqrt(var + EPS)
    o_ref[0] = (y * inv * g_ref[...] + b_ref[...]).astype(o_ref.dtype)


# -----------------------------------------------------------------------------
# Planning helpers
# -----------------------------------------------------------------------------
def _vmem_capacity_bytes():
    try:
        return int(pltpu.get_tpu_info().vmem_capacity_bytes)
    except Exception:
        return 64 * 1024 * 1024          # conservative (v7x per-TensorCore)


def _pick_tile_p(P, cap, align):
    """Largest spatial tile <= cap, preferring divisors of P aligned to `align`.

    If P has no usable aligned divisor, returns an aligned cap and the caller
    uses a pl.cdiv grid (Pallas masks the ragged last tile).
    """
    if P <= cap:
        return P
    cap_aligned = max(align, (cap // align) * align)
    t = cap_aligned
    while t >= align:
        if P % t == 0:
            return t
        t -= align
    return cap_aligned


def _working_set(tile_p, D, D_out, in_it, c_it, o_it):
    return (2 * tile_p * D * in_it          # x tile (double-buffered)
            + 2 * D * D_out * c_it          # conv weight (<= 2 buffers)
            + 2 * tile_p * D_out * o_it     # output tile (double-buffered)
            + 2 * tile_p * D_out * 4        # f32 y + epilogue temporaries
            + tile_p * D * c_it             # in-kernel cast copy of x
            + 16 * D_out * 4                # focal bias / gamma / beta
            + (2 << 20))                    # compiler scratch headroom


def _plan(P, B, D, D_out, in_it, c_it, o_it, align, tile_p=None):
    """Pick (tile_p, vmem_limit_bytes) against the physical VMEM budget."""
    phys = _vmem_capacity_bytes()
    budget = phys - (8 << 20)               # leave >= 8 MiB headroom
    if tile_p is None:
        cap = 2048 if phys >= (100 << 20) else 1024
        tile_p = _pick_tile_p(P, cap, align)
        # Keep >= 2 grid points so dual-TC chips (v7x) shard the 'parallel'
        # axes and the DMA pipeline has something to overlap.
        if B * pl.cdiv(P, tile_p) < 2 and P >= 2 * align:
            tile_p = _pick_tile_p(P, max(align, P // 2), align)
        while _working_set(tile_p, D, D_out, in_it, c_it, o_it) > budget and tile_p > align:
            tile_p = _pick_tile_p(P, max(align, tile_p // 2), align)
    ws = _working_set(tile_p, D, D_out, in_it, c_it, o_it)
    vmem_limit = int(min(budget, max(32 << 20, 1.3 * ws)))
    return tile_p, vmem_limit


def _prep_params(K, params, compute_dtype):
    """Focal Linear, conv-weight split, and LayerNorm mean folding (wrapper glue).

    Returns:
      w_img: (D_out, D)  mean-centered image-channel slice of the 1x1 conv
             weight, cast to `compute_dtype` (MXU feed).
      fe_b:  (B, D_out)  mean-centered per-batch focal contribution, f32.
      gamma, beta: (D_out,) f32 LayerNorm affine params.
      d_img, d_out: ints.
    """
    embed_w = params["embed_w"].astype(jnp.float32)           # (D_embed, 1)
    embed_b = params["embed_b"].astype(jnp.float32)           # (D_embed,)
    d_embed = embed_w.shape[0]
    conv_w = params["conv_w"].astype(jnp.float32)
    d_out = conv_w.shape[0]
    conv_w = conv_w.reshape(d_out, -1)                         # (D_out, D + D_embed)
    d_img = conv_w.shape[1] - d_embed

    focal = (K[:, 0, 0] + K[:, 1, 1]).astype(jnp.float32) / 2.0 / 1000.0 - 1.0   # [B]
    fe = focal[:, None] * embed_w[None, :, 0] + embed_b[None, :]                 # [B, D_embed]

    w_img = conv_w[:, :d_img]                                  # (D_out, D)
    w_fe = conv_w[:, d_img:]                                   # (D_out, D_embed)
    fe_b = fe @ w_fe.T                                         # (B, D_out)

    # Fold the LayerNorm mean subtraction into the weights: center over the
    # output-channel axis so y = W_c @ x + fe_c is zero-mean over channels.
    w_img = w_img - jnp.mean(w_img, axis=0, keepdims=True)
    fe_b = fe_b - jnp.mean(fe_b, axis=-1, keepdims=True)

    gamma = params["ln_w"].astype(jnp.float32)
    beta = params["ln_b"].astype(jnp.float32)
    return w_img.astype(compute_dtype), fe_b, gamma, beta, d_img, d_out


def _run_with_fallback(build, args):
    """Prefer single-buffering the constant-index operands (saves VMEM); fall
    back to default double-buffering if this jax build rejects pl.Buffered(1)."""
    try:
        return build(True)(*args)
    except Exception:
        return build(False)(*args)


# -----------------------------------------------------------------------------
# Entry points
# -----------------------------------------------------------------------------
def camera_encoder_focal(img_embeddings, K, params, *, tile_p=None,
                         compute_dtype=jnp.bfloat16, out_dtype=None):
    """NCHW entry point matching the PyTorch module (no HBM transposes).

    img_embeddings: [B, D, h, w];  K: [B, 3, 3].  Returns [B, D_out, h, w].
    Pass out_dtype=jnp.bfloat16 if the consumer accepts bf16 (halves the
    output HBM writes on bandwidth-bound chips).
    """
    B, D, h, w = img_embeddings.shape
    P = h * w
    x = img_embeddings.reshape(B, D, P)            # free reshape, layout kept channels-first
    out_dtype = img_embeddings.dtype if out_dtype is None else out_dtype

    w_img, fe_b, gamma, beta, d_img, D_out = _prep_params(K, params, compute_dtype)
    assert d_img == D, "conv weight does not match image channel count"
    feb = fe_b.reshape(B, D_out, 1)
    g = gamma.reshape(D_out, 1)
    b = beta.reshape(D_out, 1)

    tile_p, vmem_limit = _plan(
        P, B, D, D_out,
        jnp.dtype(x.dtype).itemsize, jnp.dtype(compute_dtype).itemsize,
        jnp.dtype(out_dtype).itemsize, align=128, tile_p=tile_p)
    n_p = pl.cdiv(P, tile_p)

    def build(single_buffer_consts):
        const_kw = ({"pipeline_mode": pl.Buffered(1)} if single_buffer_consts else {})
        return pl.pallas_call(
            _cam_kernel_nchw,
            out_shape=jax.ShapeDtypeStruct((B, D_out, P), out_dtype),
            grid_spec=pltpu.PrefetchScalarGridSpec(
                num_scalar_prefetch=0,
                grid=(B, n_p),
                in_specs=[
                    pl.BlockSpec((1, D, tile_p), lambda bi, pi: (bi, 0, pi)),
                    pl.BlockSpec((1, D_out, 1), lambda bi, pi: (bi, 0, 0)),
                    pl.BlockSpec((D_out, D), lambda bi, pi: (0, 0), **const_kw),
                    pl.BlockSpec((D_out, 1), lambda bi, pi: (0, 0), **const_kw),
                    pl.BlockSpec((D_out, 1), lambda bi, pi: (0, 0), **const_kw),
                ],
                out_specs=pl.BlockSpec((1, D_out, tile_p),
                                       lambda bi, pi: (bi, 0, pi)),
            ),
            compiler_params=pltpu.CompilerParams(
                dimension_semantics=("parallel", "parallel"),
                vmem_limit_bytes=vmem_limit),
        )

    out = _run_with_fallback(build, (x, feb, w_img, g, b))
    return out.reshape(B, D_out, h, w)


def camera_encoder_focal_bpc(x_bpc, K, params, *, tile_p=None,
                             compute_dtype=jnp.bfloat16, out_dtype=None):
    """Channels-last entry point for callers keeping activations as [B, P, D]."""
    B, P, D = x_bpc.shape
    out_dtype = x_bpc.dtype if out_dtype is None else out_dtype

    w_img, fe_b, gamma, beta, d_img, D_out = _prep_params(K, params, compute_dtype)
    assert d_img == D, "conv weight does not match image channel count"
    w = jnp.transpose(w_img)                       # (D, D_out): tiny one-off weight transpose
    feb = fe_b.reshape(B, 1, D_out)
    g = gamma.reshape(1, D_out)
    b = beta.reshape(1, D_out)

    tile_p, vmem_limit = _plan(
        P, B, D, D_out,
        jnp.dtype(x_bpc.dtype).itemsize, jnp.dtype(compute_dtype).itemsize,
        jnp.dtype(out_dtype).itemsize, align=8, tile_p=tile_p)
    n_p = pl.cdiv(P, tile_p)

    def build(single_buffer_consts):
        const_kw = ({"pipeline_mode": pl.Buffered(1)} if single_buffer_consts else {})
        return pl.pallas_call(
            _cam_kernel_bpc,
            out_shape=jax.ShapeDtypeStruct((B, P, D_out), out_dtype),
            grid_spec=pltpu.PrefetchScalarGridSpec(
                num_scalar_prefetch=0,
                grid=(B, n_p),
                in_specs=[
                    pl.BlockSpec((1, tile_p, D), lambda bi, pi: (bi, pi, 0)),
                    pl.BlockSpec((1, 1, D_out), lambda bi, pi: (bi, 0, 0)),
                    pl.BlockSpec((D, D_out), lambda bi, pi: (0, 0), **const_kw),
                    pl.BlockSpec((1, D_out), lambda bi, pi: (0, 0), **const_kw),
                    pl.BlockSpec((1, D_out), lambda bi, pi: (0, 0), **const_kw),
                ],
                out_specs=pl.BlockSpec((1, tile_p, D_out),
                                       lambda bi, pi: (bi, pi, 0)),
            ),
            compiler_params=pltpu.CompilerParams(
                dimension_semantics=("parallel", "parallel"),
                vmem_limit_bytes=vmem_limit),
        )

    return _run_with_fallback(build, (x_bpc, feb, w, g, b))


# -----------------------------------------------------------------------------
# Reference & test
# -----------------------------------------------------------------------------
def _reference(img_embeddings, K, params):
    """Pure-JAX reference replicating the PyTorch forward (all f32, two-pass LN)."""
    B, D, h, w = img_embeddings.shape
    D_embed = params["embed_w"].shape[0]
    D_out = params["conv_w"].shape[0]
    focal = (K[:, 0, 0] + K[:, 1, 1]) / 2.0 / 1000.0 - 1.0
    fe = focal[:, None] * params["embed_w"][None, :, 0] + params["embed_b"]
    fe_map = jnp.broadcast_to(fe[:, :, None, None], (B, D_embed, h, w))
    z = jnp.concatenate([img_embeddings, fe_map], axis=1)
    W = params["conv_w"].reshape(D_out, D + D_embed)
    z = jnp.einsum("oc,bchw->bohw", W, z)
    u = jnp.mean(z, axis=1, keepdims=True)
    s = jnp.mean((z - u) ** 2, axis=1, keepdims=True)
    z = (z - u) / jnp.sqrt(s + EPS)
    return params["ln_w"][None, :, None, None] * z + params["ln_b"][None, :, None, None]


def make_params(key, d_img, d_embed, d_out):
    k1, k2, k3 = jax.random.split(key, 3)
    return {
        "embed_w": jax.random.normal(k1, (d_embed, 1), jnp.float32) * 0.1,   # Linear(1, d_embed)
        "embed_b": jax.random.normal(k2, (d_embed,), jnp.float32) * 0.1,
        "conv_w": jax.random.normal(k3, (d_out, d_img + d_embed, 1, 1), jnp.float32) * 0.02,
        "ln_w": jnp.ones((d_out,), jnp.float32),
        "ln_b": jnp.zeros((d_out,), jnp.float32),
    }


if __name__ == "__main__":
    # Small shapes consistent with the module (real module uses D=D_out=1024, h=w=64):
    B, D, h, w = 2, 128, 8, 8
    D_EMBED, D_OUT = 32, 128

    key = jax.random.PRNGKey(0)
    k_img, k_f, k_p = jax.random.split(key, 3)

    img_embeddings = jax.random.normal(k_img, (B, D, h, w), jnp.float32)
    focals = 500.0 + 1500.0 * jax.random.uniform(k_f, (B,), jnp.float32)
    K = jnp.zeros((B, 3, 3), jnp.float32)
    K = K.at[:, 0, 0].set(focals).at[:, 1, 1].set(focals).at[:, 2, 2].set(1.0)
    K = K.at[:, 0, 2].set(w * 7.0).at[:, 1, 2].set(h * 7.0)

    params = make_params(k_p, D, D_EMBED, D_OUT)
    ref = _reference(img_embeddings, K, params)

    # NCHW path, f32 compute: tight check against the pure-JAX reference.
    out_f32 = camera_encoder_focal(img_embeddings, K, params,
                                   compute_dtype=jnp.float32)
    out_f32 = jax.block_until_ready(out_f32)
    assert out_f32.shape == (B, D_OUT, h, w)
    assert jnp.allclose(out_f32, ref, atol=2e-3, rtol=2e-3), "f32 mismatch vs reference"

    # NCHW path, bf16 MXU feed (default): looser tolerance.
    out_bf16 = camera_encoder_focal(img_embeddings, K, params)
    out_bf16 = jax.block_until_ready(out_bf16)
    assert out_bf16.shape == (B, D_OUT, h, w)
    assert jnp.allclose(out_bf16, ref, atol=5e-2, rtol=5e-2), "bf16 mismatch vs reference"

    # Channels-last path for callers that keep activations as [B, P, D].
    x_bpc = jnp.transpose(img_embeddings, (0, 2, 3, 1)).reshape(B, h * w, D)
    out_bpc = camera_encoder_focal_bpc(x_bpc, K, params)
    out_bpc = jax.block_until_ready(out_bpc)
    ref_bpc = jnp.transpose(ref, (0, 2, 3, 1)).reshape(B, h * w, D_OUT)
    assert out_bpc.shape == (B, h * w, D_OUT)
    assert jnp.allclose(out_bpc, ref_bpc, atol=5e-2, rtol=5e-2), "bpc mismatch vs reference"

    print("KERNEL_OK")
</pallas_src>

<mosaic_0001>
module attributes {stable_mosaic.version = 11 : i64} {
  func.func @_cam_kernel_nchw(%arg0: i32, %arg1: i32, %arg2: memref<1x128x64xf32, #tpu.memory_space<vmem>>, %arg3: memref<1x128x1xf32, #tpu.memory_space<vmem>>, %arg4: memref<128x128xf32, #tpu.memory_space<vmem>>, %arg5: memref<128x1xf32, #tpu.memory_space<vmem>>, %arg6: memref<128x1xf32, #tpu.memory_space<vmem>>, %arg7: memref<1x128x64xf32, #tpu.memory_space<vmem>>) attributes {dimension_semantics = [#tpu.dimension_semantics<parallel>, #tpu.dimension_semantics<parallel>], iteration_bounds = array<i64: 2, 1>, scalar_prefetch = 0 : i64, scratch_operands = 0 : i64, tpu.core_type = #tpu.core_type<tc>, window_params = [{transform_indices = @transform_0, window_bounds = array<i64: 1, 128, 64>}, {transform_indices = @transform_1, window_bounds = array<i64: 1, 128, 1>}, {pipeline_mode = #tpu.pipeline_mode<synchronous>, transform_indices = @transform_2, window_bounds = array<i64: 128, 128>}, {pipeline_mode = #tpu.pipeline_mode<synchronous>, transform_indices = @transform_3, window_bounds = array<i64: 128, 1>}, {pipeline_mode = #tpu.pipeline_mode<synchronous>, transform_indices = @transform_4, window_bounds = array<i64: 128, 1>}, {transform_indices = @transform_5, window_bounds = array<i64: 1, 128, 64>}]} {
    %c0 = arith.constant 0 : index
    %c0_0 = arith.constant 0 : index
    %c0_1 = arith.constant 0 : index
    %0 = vector.load %arg2[%c0, %c0_0, %c0_1] : memref<1x128x64xf32, #tpu.memory_space<vmem>>, vector<1x128x64xf32>
    %1 = vector.shape_cast %0 : vector<1x128x64xf32> to vector<128x64xf32>
    %c0_2 = arith.constant 0 : index
    %c0_3 = arith.constant 0 : index
    %2 = vector.load %arg4[%c0_2, %c0_3] : memref<128x128xf32, #tpu.memory_space<vmem>>, vector<128x128xf32>
    %cst = arith.constant dense<0.000000e+00> : vector<128x64xf32>
    %3 = tpu.matmul %2, %1, %cst {dimension_numbers = #tpu.dot_dimension_numbers<[1], [0], [0], [1], [0, 0, 1, 1], [], []>} : vector<128x128xf32>, vector<128x64xf32>, vector<128x64xf32> -> vector<128x64xf32>
    %c0_4 = arith.constant 0 : index
    %c0_5 = arith.constant 0 : index
    %c0_6 = arith.constant 0 : index
    %4 = vector.load %arg3[%c0_4, %c0_5, %c0_6] : memref<1x128x1xf32, #tpu.memory_space<vmem>>, vector<1x128x1xf32>
    %5 = vector.shape_cast %4 : vector<1x128x1xf32> to vector<128x1xf32>
    %6 = vector.broadcast %5 : vector<128x1xf32> to vector<128x64xf32>
    %7 = arith.addf %3, %6 : vector<128x64xf32>
    %8 = arith.mulf %7, %7 : vector<128x64xf32>
    %cst_7 = arith.constant dense<0.000000e+00> : vector<64xf32>
    %9 = vector.multi_reduction <add>, %8, %cst_7 [0] : vector<128x64xf32> to vector<64xf32>
    %10 = vector.shape_cast %9 : vector<64xf32> to vector<1x64xf32>
    %cst_8 = arith.constant 7.812500e-03 : f32
    %11 = vector.broadcast %cst_8 : f32 to vector<1x64xf32>
    %12 = arith.mulf %10, %11 : vector<1x64xf32>
    %cst_9 = arith.constant 9.99999997E-7 : f32
    %13 = vector.broadcast %cst_9 : f32 to vector<1x64xf32>
    %14 = arith.addf %12, %13 : vector<1x64xf32>
    %15 = math.rsqrt %14 : vector<1x64xf32>
    %16 = vector.broadcast %15 : vector<1x64xf32> to vector<128x64xf32>
    %17 = arith.mulf %7, %16 : vector<128x64xf32>
    %c0_10 = arith.constant 0 : index
    %c0_11 = arith.constant 0 : index
    %18 = vector.load %arg5[%c0_10, %c0_11] : memref<128x1xf32, #tpu.memory_space<vmem>>, vector<128x1xf32>
    %19 = vector.broadcast %18 : vector<128x1xf32> to vector<128x64xf32>
    %20 = arith.mulf %17, %19 : vector<128x64xf32>
    %c0_12 = arith.constant 0 : index
    %c0_13 = arith.constant 0 : index
    %21 = vector.load %arg6[%c0_12, %c0_13] : memref<128x1xf32, #tpu.memory_space<vmem>>, vector<128x1xf32>
    %22 = vector.broadcast %21 : vector<128x1xf32> to vector<128x64xf32>
    %23 = arith.addf %20, %22 : vector<128x64xf32>
    %c0_14 = arith.constant 0 : index
    %c0_15 = arith.constant 0 : index
    %c0_16 = arith.constant 0 : index
    %24 = vector.load %arg7[%c0_14, %c0_15, %c0_16] : memref<1x128x64xf32, #tpu.memory_space<vmem>>, vector<1x128x64xf32>
    %25 = vector.shape_cast %24 : vector<1x128x64xf32> to vector<128x64xf32>
    %26 = vector.shape_cast %23 : vector<128x64xf32> to vector<1x128x64xf32>
    tpu.vector_store %arg7[%c0_14, %c0_15, %c0_16], %26 {strides = array<i32>} : memref<1x128x64xf32, #tpu.memory_space<vmem>>, vector<1x128x64xf32>,
    return
  }
  func.func @transform_0(%arg0: i32, %arg1: i32) -> (i32, i32, i32) {
    %c0_i32 = arith.constant 0 : i32
    %c0_i32_0 = arith.constant 0 : i32
    return %arg0, %c0_i32, %arg1 : i32, i32, i32
  }
  func.func @transform_1(%arg0: i32, %arg1: i32) -> (i32, i32, i32) {
    %c0_i32 = arith.constant 0 : i32
    %c0_i32_0 = arith.constant 0 : i32
    %c0_i32_1 = arith.constant 0 : i32
    return %arg0, %c0_i32, %c0_i32_0 : i32, i32, i32
  }
  func.func @transform_2(%arg0: i32, %arg1: i32) -> (i32, i32) {
    %c0_i32 = arith.constant 0 : i32
    %c0_i32_0 = arith.constant 0 : i32
    %c0_i32_1 = arith.constant 0 : i32
    return %c0_i32, %c0_i32_0 : i32, i32
  }
  func.func @transform_3(%arg0: i32, %arg1: i32) -> (i32, i32) {
    %c0_i32 = arith.constant 0 : i32
    %c0_i32_0 = arith.constant 0 : i32
    %c0_i32_1 = arith.constant 0 : i32
    return %c0_i32, %c0_i32_0 : i32, i32
  }
  func.func @transform_4(%arg0: i32, %arg1: i32) -> (i32, i32) {
    %c0_i32 = arith.constant 0 : i32
    %c0_i32_0 = arith.constant 0 : i32
    %c0_i32_1 = arith.constant 0 : i32
    return %c0_i32, %c0_i32_0 : i32, i32
  }
  func.func @transform_5(%arg0: i32, %arg1: i32) -> (i32, i32, i32) {
    %c0_i32 = arith.constant 0 : i32
    %c0_i32_0 = arith.constant 0 : i32
    return %arg0, %c0_i32, %arg1 : i32, i32, i32
  }
}

module attributes {stable_mosaic.version = 11 : i64} {
  func.func @_cam_kernel_nchw(%arg0: i32, %arg1: i32, %arg2: memref<1x128x64xf32, #tpu.memory_space<vmem>>, %arg3: memref<1x128x1xf32, #tpu.memory_space<vmem>>, %arg4: memref<128x128xf32, #tpu.memory_space<vmem>>, %arg5: memref<128x1xf32, #tpu.memory_space<vmem>>, %arg6: memref<128x1xf32, #tpu.memory_space<vmem>>, %arg7: memref<1x128x64xf32, #tpu.memory_space<vmem>>) attributes {dimension_semantics = [#tpu.dimension_semantics<parallel>, #tpu.dimension_semantics<parallel>], iteration_bounds = array<i64: 2, 1>, scalar_prefetch = 0 : i64, scratch_operands = 0 : i64, tpu.core_type = #tpu.core_type<tc>, window_params = [{transform_indices = @transform_0, window_bounds = array<i64: 1, 128, 64>}, {transform_indices = @transform_1, window_bounds = array<i64: 1, 128, 1>}, {pipeline_mode = #tpu.pipeline_mode<synchronous>, transform_indices = @transform_2, window_bounds = array<i64: 128, 128>}, {pipeline_mode = #tpu.pipeline_mode<synchronous>, transform_indices = @transform_3, window_bounds = array<i64: 128, 1>}, {pipeline_mode = #tpu.pipeline_mode<synchronous>, transform_indices = @transform_4, window_bounds = array<i64: 128, 1>}, {transform_indices = @transform_5, window_bounds = array<i64: 1, 128, 64>}]} {
    %c0 = arith.constant 0 : index
    %c0_0 = arith.constant 0 : index
    %c0_1 = arith.constant 0 : index
    %0 = vector.load %arg2[%c0, %c0_0, %c0_1] : memref<1x128x64xf32, #tpu.memory_space<vmem>>, vector<1x128x64xf32>
    %1 = vector.shape_cast %0 : vector<1x128x64xf32> to vector<128x64xf32>
    %c0_2 = arith.constant 0 : index
    %c0_3 = arith.constant 0 : index
    %2 = vector.load %arg4[%c0_2, %c0_3] : memref<128x128xf32, #tpu.memory_space<vmem>>, vector<128x128xf32>
    %cst = arith.constant dense<0.000000e+00> : vector<128x64xf32>
    %3 = tpu.matmul %2, %1, %cst {dimension_numbers = #tpu.dot_dimension_numbers<[1], [0], [0], [1], [0, 0, 1, 1], [], []>} : vector<128x128xf32>, vector<128x64xf32>, vector<128x64xf32> -> vector<128x64xf32>
    %c0_4 = arith.constant 0 : index
    %c0_5 = arith.constant 0 : index
    %c0_6 = arith.constant 0 : index
    %4 = vector.load %arg3[%c0_4, %c0_5, %c0_6] : memref<1x128x1xf32, #tpu.memory_space<vmem>>, vector<1x128x1xf32>
    %5 = vector.shape_cast %4 : vector<1x128x1xf32> to vector<128x1xf32>
    %6 = vector.broadcast %5 : vector<128x1xf32> to vector<128x64xf32>
    %7 = arith.addf %3, %6 : vector<128x64xf32>
    %8 = arith.mulf %7, %7 : vector<128x64xf32>
    %cst_7 = arith.constant dense<0.000000e+00> : vector<64xf32>
    %9 = vector.multi_reduction <add>, %8, %cst_7 [0] : vector<128x64xf32> to vector<64xf32>
    %10 = vector.shape_cast %9 : vector<64xf32> to vector<1x64xf32>
    %cst_8 = arith.constant 7.812500e-03 : f32
    %11 = vector.broadcast %cst_8 : f32 to vector<1x64xf32>
    %12 = arith.mulf %10, %11 : vector<1x64xf32>
    %cst_9 = arith.constant 9.99999997E-7 : f32
    %13 = vector.broadcast %cst_9 : f32 to vector<1x64xf32>
    %14 = arith.addf %12, %13 : vector<1x64xf32>
    %15 = math.rsqrt %14 : vector<1x64xf32>
    %16 = vector.broadcast %15 : vector<1x64xf32> to vector<128x64xf32>
    %17 = arith.mulf %7, %16 : vector<128x64xf32>
    %c0_10 = arith.constant 0 : index
    %c0_11 = arith.constant 0 : index
    %18 = vector.load %arg5[%c0_10, %c0_11] : memref<128x1xf32, #tpu.memory_space<vmem>>, vector<128x1xf32>
    %19 = vector.broadcast %18 : vector<128x1xf32> to vector<128x64xf32>
    %20 = arith.mulf %17, %19 : vector<128x64xf32>
    %c0_12 = arith.constant 0 : index
    %c0_13 = arith.constant 0 : index
    %21 = vector.load %arg6[%c0_12, %c0_13] : memref<128x1xf32, #tpu.memory_space<vmem>>, vector<128x1xf32>
    %22 = vector.broadcast %21 : vector<128x1xf32> to vector<128x64xf32>
    %23 = arith.addf %20, %22 : vector<128x64xf32>
    %c0_14 = arith.constant 0 : index
    %c0_15 = arith.constant 0 : index
    %c0_16 = arith.constant 0 : index
    %24 = vector.load %arg7[%c0_14, %c0_15, %c0_16] : memref<1x128x64xf32, #tpu.memory_space<vmem>>, vector<1x128x64xf32>
    %25 = vector.shape_cast %24 : vector<1x128x64xf32> to vector<128x64xf32>
    %26 = vector.shape_cast %23 : vector<128x64xf32> to vector<1x128x64xf32>
    tpu.vector_store %arg7[%c0_14, %c0_15, %c0_16], %26 {strides = array<i32>} : memref<1x128x64xf32, #tpu.memory_space<vmem>>, vector<1x128x64xf32>,
    return
  }
  func.func @transform_0(%arg0: i32, %arg1: i32) -> (i32, i32, i32) {
    %c0_i32 = arith.constant 0 : i32
    %c0_i32_0 = arith.constant 0 : i32
    return %arg0, %c0_i32, %arg1 : i32, i32, i32
  }
  func.func @transform_1(%arg0: i32, %arg1: i32) -> (i32, i32, i32) {
    %c0_i32 = arith.constant 0 : i32
    %c0_i32_0 = arith.constant 0 : i32
    %c0_i32_1 = arith.constant 0 : i32
    return %arg0, %c0_i32, %c0_i32_0 : i32, i32, i32
  }
  func.func @transform_2(%arg0: i32, %arg1: i32) -> (i32, i32) {
    %c0_i32 = arith.constant 0 : i32
    %c0_i32_0 = arith.constant 0 : i32
    %c0_i32_1 = arith.constant 0 : i32
    return %c0_i32, %c0_i32_0 : i32, i32
  }
  func.func @transform_3(%arg0: i32, %arg1: i32) -> (i32, i32) {
    %c0_i32 = arith.constant 0 : i32
    %c0_i32_0 = arith.constant 0 : i32
    %c0_i32_1 = arith.constant 0 : i32
    return %c0_i32, %c0_i32_0 : i32, i32
  }
  func.func @transform_4(%arg0: i32, %arg1: i32) -> (i32, i32) {
    %c0_i32 = arith.constant 0 : i32
    %c0_i32_0 = arith.constant 0 : i32
    %c0_i32_1 = arith.constant 0 : i32
    return %c0_i32, %c0_i32_0 : i32, i32
  }
  func.func @transform_5(%arg0: i32, %arg1: i32) -> (i32, i32, i32) {
    %c0_i32 = arith.constant 0 : i32
    %c0_i32_0 = arith.constant 0 : i32
    return %arg0, %c0_i32, %arg1 : i32, i32, i32
  }
}

</mosaic_0001>

<bundles_post_ra>
// kernel: tpu_custom_call.1
= control target key start
LH: loop header
LB: loop body
LE: loop exit
PB: predicated region body
PF: predicated region fallthrough
CT: control target
= control target key end

     0   :  { %s1035_s18 = smov 0   ;;  %s1037_s19 = smov 0   ;;  %s1444_s0 = inlined_call_operand.vmem [shape: f32[2,128,64], index: 0, kind: input, shape index: {}]   ;;  %s1445_s1 = inlined_call_operand.vmem [shape: f32[2,128,1], index: 1, kind: input, shape index: {}]   ;;  %s1446_s2 = inlined_call_operand.vmem [shape: f32[128,128], index: 2, kind: input, shape index: {}]   ;;  %s1447_s3 = inlined_call_operand.vmem [shape: f32[128,1], index: 3, kind: input, shape index: {}]   ;;  %s1448_s4 = inlined_call_operand.vmem [shape: f32[128,1], index: 4, kind: input, shape index: {}]   ;;  %s1449_s5 = inlined_call_operand.vmem [shape: f32[2,128,64], index: 5, kind: output, shape index: {}]  }
   0x1   :  { %s1039_s20 = smov 0  }
   0x2 LB: > { %s27_s21 = sadd.s32 1, %s998_s19  ;;  %p890_p0 = scmp.ge.s32.totalorder %s1002_s20, 1  ;;  %s1002_s20 = sphi %s1039_s20, %s15_s20   ;;  %s998_s19 = sphi %s1037_s19, %s1451_s19   ;;  %s994_s18 = sphi %s1035_s18, %s1450_s18  }
   0x3   : > { %p29_p1 = scmp.ge.s32.totalorder %s27_s21, 2  ;;  %p216_p2 = scmp.lt.s32.totalorder %s1002_s20, 3 }
   0x5   : > { %s1453_s21 = smov (%p29_p1, %s27_s21), 0  ;;  %p217_p3 = pnand %p890_p0, %p216_p2 }
   0x6   : > { %p255_p4 = scmp.lt.s32.totalorder (!%p217_p3), %s994_s18, 1 }
   0x7   : > { %220 = sbr.rel (%p217_p3) target bundleno = 291 (0x123), region = 40 }
   0xc   : > { %v1004_v0 = vmov 0   ;;  %s1455_s18 = smov (!%p255_p4, %s994_s18), 1  ;;  %v292_v29 = vld [vmem:[%s1446_s2] sm:$0xff]  ;;  %v293_v36 = vld [vmem:[%s1446_s2 + $0x8] sm:$0xff]  ;;  %v294_v43 = vld [vmem:[%s1446_s2 + $0x10] sm:$0xff]  ;;  %vm485_vm0 = vcmask 523264  }
   0xd   : > { %977 = vset.pattern.permute.xlu2 %v1004_v0  ;;  %976 = vset.pattern.permute.xlu1 %v1004_v0  ;;  %s1053_s22 = sshll.u32 %s1455_s18, 7  ;;  %v296_v30 = vld [vmem:[%s1446_s2 + $0x20] sm:$0xff]  ;;  %v297_v37 = vld [vmem:[%s1446_s2 + $0x28] sm:$0xff]  ;;  %v298_v44 = vld [vmem:[%s1446_s2 + $0x30] sm:$0xff] }
   0xe   : > { %975 = vset.pattern.permute.xlu0 %v1004_v0  ;;  %s1059_s25 = scalar_lea.vmem %s1445_s1, %s1053_s22  ;;  %s1065_s28 = scalar_lea.vmem %s1444_s0, %s1053_s22  ;;  %v300_v31 = vld [vmem:[%s1446_s2 + $0x40] sm:$0xff]  ;;  %v301_v38 = vld [vmem:[%s1446_s2 + $0x48] sm:$0xff]  ;;  %v302_v45 = vld [vmem:[%s1446_s2 + $0x50] sm:$0xff] }
   0xf   : > { %v312_v1 = vld [vmem:[%s1059_s25 + $0x20] sm:$0xff]  ;;  %v310_v2 = vld [vmem:[%s1059_s25 + $0x10] sm:$0xff]  ;;  %v291_v4 = vld [vmem:[%s1065_s28 + $0x78] sm:$0xff]  ;;  %s1381_s18 = scalar_lea.vmem %s1449_s5, %s1053_s22 }
  0x10   : > { %v308_v3 = vld [vmem:[%s1059_s25] sm:$0xff]  ;;  %346 = vperm.xlu2 %977, %v312_v1   ;;  %336 = vperm.xlu1 %976, %v310_v2   ;;  %v290_v5 = vld [vmem:[%s1065_s28 + $0x70] sm:$0xff]  ;;  %v289_v6 = vld [vmem:[%s1065_s28 + $0x68] sm:$0xff] }
  0x11   : > { %326 = vperm.xlu0 %975, %v308_v3   ;;  %404 = vmatpush.msra.mxu0 %v291_v4  ;;  %v288_v7 = vld [vmem:[%s1065_s28 + $0x60] sm:$0xff]  ;;  %v313_v8 = vld [vmem:[%s1059_s25 + $0x28] sm:$0xff]  ;;  %v311_v9 = vld [vmem:[%s1059_s25 + $0x18] sm:$0xff] }
  0x12   : > { %902 = vmatpush.msra.mxu1 %v291_v4  ;;  %903 = vmatpush.msra.mxu2 %v291_v4  ;;  %v309_v10 = vld [vmem:[%s1059_s25 + $0x8] sm:$0xff]  ;;  %v287_v11 = vld [vmem:[%s1065_s28 + $0x58] sm:$0xff]  ;;  %v286_v12 = vld [vmem:[%s1065_s28 + $0x50] sm:$0xff] }
  0x13   : > { %904 = vmatpush.msra.mxu3 %v291_v4  ;;  %405 = vmatpush.msra.mxu0 %v290_v5  ;;  %v285_v13 = vld [vmem:[%s1065_s28 + $0x48] sm:$0xff]  ;;  %v284_v14 = vld [vmem:[%s1065_s28 + $0x40] sm:$0xff]  ;;  %v315_v16 = vld [vmem:[%s1059_s25 + $0x38] sm:$0xff] }
  0x14   : > { %905 = vmatpush.msra.mxu1 %v290_v5  ;;  %906 = vmatpush.msra.mxu2 %v290_v5  ;;  %v316_v15 = vld [vmem:[%s1059_s25 + $0x40] sm:$0xff]  ;;  %v314_v17 = vld [vmem:[%s1059_s25 + $0x30] sm:$0xff]  ;;  %v283_v18 = vld [vmem:[%s1065_s28 + $0x38] sm:$0xff] }
  0x15   : > { %907 = vmatpush.msra.mxu3 %v290_v5  ;;  %406 = vmatpush.msra.mxu0 %v289_v6  ;;  %v282_v19 = vld [vmem:[%s1065_s28 + $0x30] sm:$0xff]  ;;  %v281_v20 = vld [vmem:[%s1065_s28 + $0x28] sm:$0xff]  ;;  %v280_v21 = vld [vmem:[%s1065_s28 + $0x20] sm:$0xff] }
  0x16   : > { %908 = vmatpush.msra.mxu1 %v289_v6  ;;  %909 = vmatpush.msra.mxu2 %v289_v6  ;;  %v319_v22 = vld [vmem:[%s1059_s25 + $0x58] sm:$0xff]  ;;  %v318_v23 = vld [vmem:[%s1059_s25 + $0x50] sm:$0xff]  ;;  %v317_v24 = vld [vmem:[%s1059_s25 + $0x48] sm:$0xff] }
  0x17   : > { %910 = vmatpush.msra.mxu3 %v289_v6  ;;  %407 = vmatpush.msra.mxu0 %v288_v7  ;;  %v279_v25 = vld [vmem:[%s1065_s28 + $0x18] sm:$0xff]  ;;  %v278_v26 = vld [vmem:[%s1065_s28 + $0x10] sm:$0xff]  ;;  %v277_v27 = vld [vmem:[%s1065_s28 + $0x8] sm:$0xff] }
  0x18   : > { %911 = vmatpush.msra.mxu1 %v288_v7  ;;  %912 = vmatpush.msra.mxu2 %v288_v7  ;;  %v276_v28 = vld [vmem:[%s1065_s28] sm:$0xff]  ;;  %v322_v33 = vld [vmem:[%s1059_s25 + $0x70] sm:$0xff]  ;;  %v321_v34 = vld [vmem:[%s1059_s25 + $0x68] sm:$0xff] }
  0x19   : > { %913 = vmatpush.msra.mxu3 %v288_v7  ;;  %351 = vperm.xlu2 %977, %v313_v8   ;;  %v304_v32 = vld [vmem:[%s1446_s2 + $0x60] sm:$0xff]  ;;  %v305_v39 = vld [vmem:[%s1446_s2 + $0x68] sm:$0xff]  ;;  %v323_v42 = vld [vmem:[%s1059_s25 + $0x78] sm:$0xff] }
  0x1a   : > { %341 = vperm.xlu1 %976, %v311_v9   ;;  %331 = vperm.xlu0 %975, %v309_v10   ;;  %v320_v35 = vld [vmem:[%s1059_s25 + $0x60] sm:$0xff]  ;;  %v552_v40 = vld [vmem:[%s1447_s3 + $0x8] sm:$0xff]  ;;  %v306_v46 = vld [vmem:[%s1446_s2 + $0x70] sm:$0xff] }
  0x1b   : > { %408 = vmatpush.msra.mxu0 %v287_v11  ;;  %914 = vmatpush.msra.mxu1 %v287_v11  ;;  %v551_v41 = vld [vmem:[%s1447_s3] sm:$0xff]  ;;  %v554_v48 = vld [vmem:[%s1447_s3 + $0x18] sm:$0xff]  ;;  %v553_v49 = vld [vmem:[%s1447_s3 + $0x10] sm:$0xff] }
  0x1c   : > { %915 = vmatpush.msra.mxu2 %v287_v11  ;;  %916 = vmatpush.msra.mxu3 %v287_v11  ;;  %v555_v47 = vld [vmem:[%s1447_s3 + $0x20] sm:$0xff]  ;;  %v295_v50 = vld [vmem:[%s1446_s2 + $0x18] sm:$0xff]  ;;  %v557_v55 = vld [vmem:[%s1447_s3 + $0x30] sm:$0xff] }
  0x1d   : > { %409 = vmatpush.msra.mxu0 %v286_v12  ;;  %917 = vmatpush.msra.mxu1 %v286_v12  ;;  %v299_v51 = vld [vmem:[%s1446_s2 + $0x38] sm:$0xff]  ;;  %v556_v56 = vld [vmem:[%s1447_s3 + $0x28] sm:$0xff]  ;;  %v561_v57 = vld [vmem:[%s1447_s3 + $0x50] sm:$0xff] }
  0x1e   : > { %918 = vmatpush.msra.mxu2 %v286_v12  ;;  %919 = vmatpush.msra.mxu3 %v286_v12  ;;  %v303_v52 = vld [vmem:[%s1446_s2 + $0x58] sm:$0xff]  ;;  %v560_v58 = vld [vmem:[%s1447_s3 + $0x48] sm:$0xff]  ;;  %v559_v59 = vld [vmem:[%s1447_s3 + $0x40] sm:$0xff] }
  0x1f   : > { %410 = vmatpush.msra.mxu0 %v285_v13  ;;  %920 = vmatpush.msra.mxu1 %v285_v13  ;;  %v307_v53 = vld [vmem:[%s1446_s2 + $0x78] sm:$0xff]  ;;  %v564_v60 = vld [vmem:[%s1447_s3 + $0x68] sm:$0xff]  ;;  %v563_v61 = vld [vmem:[%s1447_s3 + $0x60] sm:$0xff] }
  0x20   : > { %921 = vmatpush.msra.mxu2 %v285_v13  ;;  %922 = vmatpush.msra.mxu3 %v285_v13  ;;  %v558_v54 = vld [vmem:[%s1447_s3 + $0x38] sm:$0xff]  ;;  %v663_v63 = vld [vmem:[%s1448_s4] sm:$0xff]  ;;  %v565_v1 = vld [vmem:[%s1447_s3 + $0x70] sm:$0xff] }
  0x21   : > { %411 = vmatpush.msra.mxu0 %v284_v14  ;;  %923 = vmatpush.msra.mxu1 %v284_v14  ;;  %v562_v62 = vld [vmem:[%s1447_s3 + $0x58] sm:$0xff]  ;;  %v665_v3 = vld [vmem:[%s1448_s4 + $0x10] sm:$0xff]  ;;  %v664_v4 = vld [vmem:[%s1448_s4 + $0x8] sm:$0xff] }
  0x22   : > { %924 = vmatpush.msra.mxu2 %v284_v14  ;;  %925 = vmatpush.msra.mxu3 %v284_v14  ;;  %v566_v0 = vld [vmem:[%s1447_s3 + $0x78] sm:$0xff]  ;;  %v669_v5 = vld [vmem:[%s1448_s4 + $0x30] sm:$0xff]  ;;  %v668_v6 = vld [vmem:[%s1448_s4 + $0x28] sm:$0xff] }
  0x23   : > { %366 = vperm.xlu2 %977, %v316_v15   ;;  %361 = vperm.xlu1 %976, %v315_v16   ;;  %v666_v2 = vld [vmem:[%s1448_s4 + $0x18] sm:$0xff]  ;;  %v667_v7 = vld [vmem:[%s1448_s4 + $0x20] sm:$0xff]  ;;  %v672_v8 = vld [vmem:[%s1448_s4 + $0x48] sm:$0xff] }
  0x24   : > { %356 = vperm.xlu0 %975, %v314_v17   ;;  %412 = vmatpush.msra.mxu0 %v283_v18  ;;  %v671_v9 = vld [vmem:[%s1448_s4 + $0x40] sm:$0xff]  ;;  %v670_v10 = vld [vmem:[%s1448_s4 + $0x38] sm:$0xff]  ;;  %v673_v14 = vld [vmem:[%s1448_s4 + $0x50] sm:$0xff] }
  0x25   : > { %926 = vmatpush.msra.mxu1 %v283_v18  ;;  %927 = vmatpush.msra.mxu2 %v283_v18  ;;  %v675_v12 = vld [vmem:[%s1448_s4 + $0x60] sm:$0xff]  ;;  %v674_v13 = vld [vmem:[%s1448_s4 + $0x58] sm:$0xff] }
  0x26   : > { %928 = vmatpush.msra.mxu3 %v283_v18  ;;  %413 = vmatpush.msra.mxu0 %v282_v19  ;;  %v678_v18 = vld [vmem:[%s1448_s4 + $0x78] sm:$0xff] }
  0x27   : > { %929 = vmatpush.msra.mxu1 %v282_v19  ;;  %930 = vmatpush.msra.mxu2 %v282_v19 }
  0x28   : > { %931 = vmatpush.msra.mxu3 %v282_v19  ;;  %414 = vmatpush.msra.mxu0 %v281_v20  ;;  %v677_v19 = vld [vmem:[%s1448_s4 + $0x70] sm:$0xff] }
  0x29   : > { %932 = vmatpush.msra.mxu1 %v281_v20  ;;  %933 = vmatpush.msra.mxu2 %v281_v20 }
  0x2a   : > { %934 = vmatpush.msra.mxu3 %v281_v20  ;;  %415 = vmatpush.msra.mxu0 %v280_v21  ;;  %v676_v20 = vld [vmem:[%s1448_s4 + $0x68] sm:$0xff] }
  0x2b   : > { %935 = vmatpush.msra.mxu1 %v280_v21  ;;  %936 = vmatpush.msra.mxu2 %v280_v21 }
  0x2c   : > { %937 = vmatpush.msra.mxu3 %v280_v21  ;;  %381 = vperm.xlu2 %977, %v319_v22  }
  0x2d   : > { %376 = vperm.xlu1 %976, %v318_v23   ;;  %371 = vperm.xlu0 %975, %v317_v24  }
  0x2e   : > { %416 = vmatpush.msra.mxu0 %v279_v25  ;;  %938 = vmatpush.msra.mxu1 %v279_v25 }
  0x2f   : > { %939 = vmatpush.msra.mxu2 %v279_v25  ;;  %940 = vmatpush.msra.mxu3 %v279_v25 }
  0x30   : > { %417 = vmatpush.msra.mxu0 %v278_v26  ;;  %941 = vmatpush.msra.mxu1 %v278_v26 }
  0x31   : > { %942 = vmatpush.msra.mxu2 %v278_v26  ;;  %943 = vmatpush.msra.mxu3 %v278_v26 }
  0x32   : > { %418 = vmatpush.msra.mxu0 %v277_v27  ;;  %944 = vmatpush.msra.mxu1 %v277_v27 }
  0x33   : > { %945 = vmatpush.msra.mxu2 %v277_v27  ;;  %946 = vmatpush.msra.mxu3 %v277_v27 }
  0x34   : > { %419 = vmatpush.msra.mxu0 %v276_v28  ;;  %947 = vmatpush.msra.mxu1 %v276_v28 }
  0x35   : > { %948 = vmatpush.msra.mxu2 %v276_v28  ;;  %949 = vmatpush.msra.mxu3 %v276_v28 }
  0x36   : > { %420 = vmatmul.f32.vlgmr.msra.gmra.mxu0 %v292_v29  ;;  %432 = vmatmul.f32.vlgmr.msra.gmra.mxu1 %v296_v30 }
  0x37   : > { %444 = vmatmul.f32.vlgmr.msra.gmra.mxu2 %v300_v31  ;;  %456 = vmatmul.f32.vlgmr.msra.gmra.mxu3 %v304_v32 }
  0x38   : > { %396 = vperm.xlu2 %977, %v322_v33   ;;  %391 = vperm.xlu1 %976, %v321_v34  }
  0x39   : > { %386 = vperm.xlu0 %975, %v320_v35  }
  0x3e   : > { %423 = vmatmul.f32.gmra.mxu0 %v293_v36  ;;  %435 = vmatmul.f32.gmra.mxu1 %v297_v37 }
  0x3f   : > { %447 = vmatmul.f32.gmra.mxu2 %v301_v38  ;;  %459 = vmatmul.f32.gmra.mxu3 %v305_v39 }
  0x40   : > { %574 = vperm.xlu2 %977, %v552_v40   ;;  %569 = vperm.xlu1 %976, %v551_v41  }
  0x41   : > { %401 = vperm.xlu0 %975, %v323_v42  }
  0x46   : > { %426 = vmatmul.f32.gmra.mxu0 %v294_v43  ;;  %438 = vmatmul.f32.gmra.mxu1 %v298_v44 }
  0x47   : > { %450 = vmatmul.f32.gmra.mxu2 %v302_v45  ;;  %462 = vmatmul.f32.gmra.mxu3 %v306_v46 }
  0x48   : > { %589 = vperm.xlu2 %977, %v555_v47   ;;  %584 = vperm.xlu1 %976, %v554_v48  }
  0x49   : > { %579 = vperm.xlu0 %975, %v553_v49  }
  0x4e   : > { %429 = vmatmul.f32.gmra.mxu0 %v295_v50  ;;  %441 = vmatmul.f32.gmra.mxu1 %v299_v51 }
  0x4f   : > { %453 = vmatmul.f32.gmra.mxu2 %v303_v52  ;;  %465 = vmatmul.f32.gmra.mxu3 %v307_v53 }
  0x50   : > { %604 = vperm.xlu2 %977, %v558_v54   ;;  %599 = vperm.xlu1 %976, %v557_v55  }
  0x51   : > { %594 = vperm.xlu0 %975, %v556_v56  }
  0x58   : > { %619 = vperm.xlu2 %977, %v561_v57   ;;  %614 = vperm.xlu1 %976, %v560_v58  }
  0x59   : > { %609 = vperm.xlu0 %975, %v559_v59  }
  0x60   : > { %634 = vperm.xlu2 %977, %v564_v60   ;;  %629 = vperm.xlu1 %976, %v563_v61  }
  0x61   : > { %624 = vperm.xlu0 %975, %v562_v62  }
  0x68   : > { %681 = vperm.xlu2 %977, %v663_v63   ;;  %644 = vperm.xlu1 %976, %v566_v0  }
  0x69   : > { %639 = vperm.xlu0 %975, %v565_v1  }
  0x6a   : > { %v347_v11 = vpop.permute.xlu2 %346 }
  0x70   : > { %696 = vperm.xlu2 %977, %v666_v2   ;;  %691 = vperm.xlu1 %976, %v665_v3  }
  0x71   : > { %686 = vperm.xlu0 %975, %v664_v4  }
  0x73   : > { %v352_v17 = vpop.permute.xlu2 %351 }
  0x78   : > { %711 = vperm.xlu2 %977, %v669_v5   ;;  %706 = vperm.xlu1 %976, %v668_v6  }
  0x79   : > { %701 = vperm.xlu0 %975, %v667_v7  }
  0x7d   : > { %v367_v23 = vpop.permute.xlu2 %366 }
  0x80   : > { %726 = vperm.xlu2 %977, %v672_v8   ;;  %721 = vperm.xlu1 %976, %v671_v9  }
  0x81   : > { %716 = vperm.xlu0 %975, %v670_v10  }
  0x82   : > { %v337_v15 = vpop.permute.xlu1 %336 }
  0x83   : > { %v327_v16 = vpop.permute.xlu0 %326 }
  0x86   : > { %v1243_v26 = vpop.permute.xlu2 %381 }
  0x88   : > { %741 = vperm.xlu2 %977, %v675_v12   ;;  %736 = vperm.xlu1 %976, %v674_v13  }
  0x89   : > { %731 = vperm.xlu0 %975, %v673_v14  }
  0x8c   : > { %v342_v21 = vpop.permute.xlu1 %341  ;;  %v332_v22 = vpop.permute.xlu0 %331 }
  0x90   : > { %756 = vperm.xlu2 %977, %v678_v18   ;;  %751 = vperm.xlu1 %976, %v677_v19  }
  0x91   : > { %746 = vperm.xlu0 %975, %v676_v20  }
  0x92   : > { %v1247_v29 = vpop.permute.xlu2 %396 }
  0x95   : > { %v362_v24 = vpop.permute.xlu1 %361 }
  0x96   : > { %v357_v25 = vpop.permute.xlu0 %356 }
  0x9a   : > { %v1253_v32 = vpop.permute.xlu2 %574 }
  0x9f   : > { %v1245_v27 = vpop.permute.xlu1 %376  ;;  %v372_v28 = vpop.permute.xlu0 %371 }
  0xa2   : > { %v1259_v38 = vpop.permute.xlu2 %589 }
  0xaa   : > { %v1249_v30 = vpop.permute.xlu1 %391  ;;  %v1271_v50 = vpop.permute.xlu2 %604 }
  0xab   : > { %v1251_v31 = vpop.permute.xlu0 %386 }
  0xb2   : > { %v1255_v35 = vpop.permute.xlu1 %569  ;;  %v1298_v6 = vpop.permute.xlu2 %619 }
  0xb3   : > { %v421_v33 = vpop.f32.mrf.mxu0  ;;  %v433_v34 = vpop.f32.mrf.mxu1 }
  0xb4   : > { %v1257_v36 = vpop.permute.xlu0 %401  ;;  %v1267_v47 = vadd.f32 %v421_v33, %v327_v16  ;;  %v1279_v55 = vadd.f32 %v433_v34, %v347_v11 }
  0xb6   : > { %v469_v52 = vmul.f32 %v1267_v47, %v1267_v47  ;;  %v473_v3 = vmul.f32 %v1279_v55, %v1279_v55 }
  0xb8   : > { %v486_v59 = vsel %vm485_vm0, %v469_v52, 0.0  ;;  %v493_v12 = vsel %vm485_vm0, %v473_v3, 0.0 }
  0xba   : > { %v445_v37 = vpop.f32.mrf.mxu2  ;;  %v457_v41 = vpop.f32.mrf.mxu3 }
  0xbb   : > { %v424_v39 = vpop.f32.mrf.mxu0  ;;  %v436_v40 = vpop.f32.mrf.mxu1  ;;  %v1306_v13 = vadd.f32 %v445_v37, %v367_v23 }
  0xbc   : > { %v1261_v42 = vpop.permute.xlu1 %584  ;;  %v1263_v43 = vadd.f32 %v424_v39, %v332_v22  ;;  %v1265_v45 = vpop.permute.xlu0 %579  ;;  %v1283_v60 = vadd.f32 %v436_v40, %v352_v17 }
  0xbd   : > { %v477_v22 = vmul.f32 %v1306_v13, %v1306_v13  ;;  %v1331_v40 = vpop.permute.xlu2 %634 }
  0xbe   : > { %v470_v51 = vmul.f32 %v1263_v43, %v1263_v43  ;;  %v474_v8 = vmul.f32 %v1283_v60, %v1283_v60 }
  0xc0   : > { %v487_v56 = vsel %vm485_vm0, %v470_v51, 0.0  ;;  %v495_v17 = vsel %vm485_vm0, %v474_v8, 0.0 }
  0xc1   : > { %v488_v0 = vadd.f32 %v487_v56, %v486_v59 }
  0xc2   : > { %v448_v44 = vpop.f32.mrf.mxu2  ;;  %v460_v54 = vpop.f32.mrf.mxu3 }
  0xc3   : > { %v427_v46 = vpop.f32.mrf.mxu0  ;;  %v439_v49 = vpop.f32.mrf.mxu1  ;;  %v1311_v18 = vadd.f32 %v448_v44, %v372_v28 }
  0xc4   : > { %v1269_v48 = vadd.f32 %v427_v46, %v337_v15  ;;  %v1285_v61 = vpop.permute.xlu1 %599  ;;  %v1290_v1 = vpop.permute.xlu0 %594  ;;  %v1294_v4 = vadd.f32 %v439_v49, %v357_v25  ;;  %v501_v46 = vsel %vm485_vm0, %v477_v22, 0.0  ;;  %v1335_v49 = vadd.f32 %v457_v41, %v1251_v31 }
  0xc5   : > { %v478_v28 = vmul.f32 %v1311_v18, %v1311_v18  ;;  %v682_v8 = vpop.permute.xlu2 %681 }
  0xc6   : > { %v471_v53 = vmul.f32 %v1269_v48, %v1269_v48  ;;  %v475_v14 = vmul.f32 %v1294_v4, %v1294_v4 }
  0xc7   : > { %v503_v52 = vsel %vm485_vm0, %v478_v28, 0.0 }
  0xc8   : > { %v489_v62 = vsel %vm485_vm0, %v471_v53, 0.0  ;;  %v497_v23 = vsel %vm485_vm0, %v475_v14, 0.0  ;;  %v1341_v53 = vadd.f32 %v460_v54, %v1249_v30 }
  0xc9   : > { %v490_v7 = vadd.f32 %v489_v62, %v488_v0 }
  0xca   : > { %v451_v57 = vpop.f32.mrf.mxu2  ;;  %v463_v15 = vpop.f32.mrf.mxu3  ;;  %v482_v62 = vmul.f32 %v1341_v53, %v1341_v53 }
  0xcb   : > { %v430_v58 = vpop.f32.mrf.mxu0  ;;  %v442_v2 = vpop.f32.mrf.mxu1  ;;  %v1321_v25 = vadd.f32 %v451_v57, %v1245_v27  ;;  %v1349_v41 = vadd.f32 %v463_v15, %v1247_v29 }
  0xcc   : > { %v1288_v63 = vadd.f32 %v430_v58, %v342_v21  ;;  %v1303_v10 = vadd.f32 %v442_v2, %v362_v24  ;;  %v1318_v24 = vpop.permute.xlu1 %614  ;;  %v1323_v33 = vpop.permute.xlu0 %609  ;;  %v481_v58 = vmul.f32 %v1335_v49, %v1335_v49 }
  0xcd   : > { %v479_v27 = vmul.f32 %v1321_v25, %v1321_v25 }
  0xce   : > { %v472_v5 = vmul.f32 %v1288_v63, %v1288_v63  ;;  %v476_v19 = vmul.f32 %v1303_v10, %v1303_v10 }
  0xcf   : > { %v505_v31 = vsel %vm485_vm0, %v479_v27, 0.0 }
  0xd0   : > { %v491_v9 = vsel %vm485_vm0, %v472_v5, 0.0  ;;  %v499_v37 = vsel %vm485_vm0, %v476_v19, 0.0  ;;  %v509_v5 = vsel %vm485_vm0, %v481_v58, 0.0 }
  0xd1   : > { %v492_v11 = vadd.f32 %v491_v9, %v490_v7  ;;  %v483_v7 = vmul.f32 %v1349_v41, %v1349_v41  ;;  %v511_v9 = vsel %vm485_vm0, %v482_v62, 0.0 }
  0xd2   : > { %v454_v21 = vpop.f32.mrf.mxu2  ;;  %v466_v57 = vpop.f32.mrf.mxu3 }
  0xd3   : > { %v494_v16 = vadd.f32 %v493_v12, %v492_v11  ;;  %v1329_v39 = vadd.f32 %v454_v21, %v1243_v26  ;;  %v467_v54 = vadd.f32 %v466_v57, %v1257_v36  ;;  %v513_v14 = vsel %vm485_vm0, %v483_v7, 0.0  ;;  %v697_v21 = vpop.permute.xlu2 %696 }
  0xd4   : > { %v630_v0 = vpop.permute.xlu1 %629  ;;  %v1355_v2 = vpop.permute.xlu0 %624 }
  0xd5   : > { %v496_v20 = vadd.f32 %v495_v17, %v494_v16  ;;  %v480_v26 = vmul.f32 %v1329_v39, %v1329_v39  ;;  %v484_v11 = vmul.f32 %v467_v54, %v467_v54 }
  0xd7   : > { %v498_v34 = vadd.f32 %v497_v23, %v496_v20  ;;  %v507_v30 = vsel %vm485_vm0, %v480_v26, 0.0  ;;  %v515_v16 = vsel %vm485_vm0, %v484_v11, 0.0 }
  0xd9   : > { %v500_v44 = vadd.f32 %v499_v37, %v498_v34 }
  0xdb   : > { %v502_v51 = vadd.f32 %v501_v46, %v500_v44  ;;  %v712_v27 = vpop.permute.xlu2 %711 }
  0xdc   : > { %v645_v17 = vpop.permute.xlu1 %644  ;;  %v1363_v20 = vpop.permute.xlu0 %639 }
  0xdd   : > { %v504_v56 = vadd.f32 %v503_v52, %v502_v51 }
  0xdf   : > { %v506_v59 = vadd.f32 %v505_v31, %v504_v56 }
  0xe1   : > { %v508_v3 = vadd.f32 %v507_v30, %v506_v59 }
  0xe3   : > { %v510_v29 = vadd.f32 %v509_v5, %v508_v3  ;;  %v727_v58 = vpop.permute.xlu2 %726 }
  0xe4   : > { %v692_v37 = vpop.permute.xlu1 %691  ;;  %v687_v46 = vpop.permute.xlu0 %686 }
  0xe5   : > { %v512_v12 = vadd.f32 %v511_v9, %v510_v29 }
  0xe7   : > { %v514_v15 = vadd.f32 %v513_v14, %v512_v12 }
  0xe9   : > { %v516_v36 = vadd.f32 %v515_v16, %v514_v15 }
  0xeb   : > { %v517_v19 = vrot.slane %v516_v36, 4  ;;  %v742_v29 = vpop.permute.xlu2 %741 }
  0xec   : > { %v707_v26 = vpop.permute.xlu1 %706  ;;  %v1365_v56 = vpop.permute.xlu0 %701 }
  0xed   : > { %v518_v22 = vadd.f32 %v517_v19, %v516_v36 }
  0xef   : > { %v519_v23 = vrot.slane %v518_v22, 2 }
  0xf1   : > { %v520_v34 = vadd.f32 %v519_v23, %v518_v22 }
  0xf3   : > { %v521_v28 = vrot.slane %v520_v34, 1 }
  0xf4   : > { %v722_v3 = vpop.permute.xlu1 %721  ;;  %v717_v5 = vpop.permute.xlu0 %716 }
  0xf5   : > { %v522_v44 = vadd.f32 %v521_v28, %v520_v34 }
  0xf7   : > { %v523_v51 = vmul.f32 0.0078125, %v522_v44 }
  0xf9   : > { %v524_v52 = vadd.f32 1e-06, %v523_v51 }
  0xfb   : > { %978 = vrsqrt.f32 %v524_v52  ;;  %vm531_vm2 = vweird.f32 %v524_v52 }
 0x101   : > { %v979_v57 = vpop.eup %978 }
 0x102   : > { %v526_v31 = vmul.f32 %v979_v57, %v524_v52  ;;  %vm532_vm1 = vweird.f32 %v979_v57 }
 0x103   : > { %vm533_vm3 = vmor %vm531_vm2, %vm532_vm1 }
 0x104   : > { %v527_v59 = vmul.f32 %v979_v57, %v526_v31 }
 0x106   : > { %v528_v62 = vmul.f32 0.5, %v527_v59 }
 0x108   : > { %v529_v30 = vsub.f32 1.5, %v528_v62 }
 0x10a   : > { %v530_v7 = vmul.f32 %v979_v57, %v529_v30 }
 0x10c   : > { %v534_v9 = vsel %vm533_vm3, %v979_v57, %v530_v7 }
 0x10d   : > { %v535_v11 = vmul.f32 %v534_v9, %v1267_v47  ;;  %v538_v12 = vmul.f32 %v534_v9, %v1288_v63  ;;  %v541_v14 = vmul.f32 %v534_v9, %v1294_v4  ;;  %v544_v15 = vmul.f32 %v534_v9, %v1311_v18 }
 0x10e   : > { %v550_v16 = vmul.f32 %v534_v9, %v467_v54  ;;  %v547_v36 = vmul.f32 %v534_v9, %v1335_v49  ;;  %v537_v19 = vmul.f32 %v534_v9, %v1269_v48  ;;  %v540_v54 = vmul.f32 %v534_v9, %v1283_v60  ;;  %v757_v60 = vpop.permute.xlu2 %756 }
 0x10f   : > { %v647_v22 = vmul.f32 %v1255_v35, %v535_v11  ;;  %v650_v23 = vmul.f32 %v1261_v42, %v538_v12  ;;  %v653_v34 = vmul.f32 %v1285_v61, %v541_v14  ;;  %v656_v28 = vmul.f32 %v1318_v24, %v544_v15  ;;  %v737_v24 = vpop.permute.xlu1 %736 }
 0x110   : > { %v659_v47 = vmul.f32 %v630_v0, %v547_v36  ;;  %v649_v63 = vmul.f32 %v1265_v45, %v537_v19  ;;  %v662_v42 = vmul.f32 %v645_v17, %v550_v16  ;;  %v536_v61 = vmul.f32 %v534_v9, %v1263_v43 }
 0x111   : > { %v759_v4 = vadd.f32 %v682_v8, %v647_v22  ;;  %v762_v48 = vadd.f32 %v697_v21, %v650_v23  ;;  %v765_v18 = vadd.f32 %v712_v27, %v653_v34  ;;  %v768_v35 = vadd.f32 %v727_v58, %v656_v28  ;;  %v732_v8 = vpop.permute.xlu0 %731 }
 0x112   : > { %v771_v49 = vadd.f32 %v742_v29, %v659_v47  ;;  %v539_v0 = vmul.f32 %v534_v9, %v1279_v55  ;;  %v543_v44 = vmul.f32 %v534_v9, %v1306_v13  ;;  %v542_v45 = vmul.f32 %v534_v9, %v1303_v10 }
 0x113   : > { %775 = vst.msk [vmem:[%s1381_s18] sm:$0xff] %vm485_vm0, %v759_v4  ;;  %v761_v17 = vadd.f32 %v692_v37, %v649_v63  ;;  %v648_v21 = vmul.f32 %v1253_v32, %v536_v61  ;;  %v546_v43 = vmul.f32 %v534_v9, %v1329_v39  ;;  %v545_v27 = vmul.f32 %v534_v9, %v1321_v25 }
 0x114   : > { %778 = vst.msk [vmem:[%s1381_s18 + $0x18] sm:$0xff] %vm485_vm0, %v762_v48  ;;  %v549_v55 = vmul.f32 %v534_v9, %v1349_v41  ;;  %v652_v10 = vmul.f32 %v1290_v1, %v540_v54  ;;  %v651_v13 = vmul.f32 %v1259_v38, %v539_v0  ;;  %v655_v37 = vmul.f32 %v1323_v33, %v543_v44 }
 0x115   : > { %781 = vst.msk [vmem:[%s1381_s18 + $0x30] sm:$0xff] %vm485_vm0, %v765_v18  ;;  %v760_v32 = vadd.f32 %v687_v46, %v648_v21  ;;  %v774_v39 = vadd.f32 %v757_v60, %v662_v42  ;;  %v654_v25 = vmul.f32 %v1271_v50, %v542_v45  ;;  %v548_v51 = vmul.f32 %v534_v9, %v1341_v53 }
 0x116   : > { %784 = vst.msk [vmem:[%s1381_s18 + $0x48] sm:$0xff] %vm485_vm0, %v768_v35  ;;  %v764_v41 = vadd.f32 %v707_v26, %v652_v10  ;;  %v658_v1 = vmul.f32 %v1355_v2, %v546_v43  ;;  %v763_v38 = vadd.f32 %v1365_v56, %v651_v13  ;;  %v657_v33 = vmul.f32 %v1298_v6, %v545_v27 }
 0x117   : > { %787 = vst.msk [vmem:[%s1381_s18 + $0x60] sm:$0xff] %vm485_vm0, %v771_v49  ;;  %v661_v46 = vmul.f32 %v1363_v20, %v549_v55  ;;  %v767_v50 = vadd.f32 %v722_v3, %v655_v37  ;;  %v766_v53 = vadd.f32 %v717_v5, %v654_v25  ;;  %v660_v2 = vmul.f32 %v1331_v40, %v548_v51  ;;  %v752_v26 = vpop.permute.xlu1 %751 }
 0x118   : > { %777 = vst.msk [vmem:[%s1381_s18 + $0x10] sm:$0xff] %vm485_vm0, %v761_v17  ;;  %v770_v52 = vadd.f32 %v737_v24, %v658_v1  ;;  %v769_v6 = vadd.f32 %v732_v8, %v657_v33 }
 0x119   : > { %776 = vst.msk [vmem:[%s1381_s18 + $0x8] sm:$0xff] %vm485_vm0, %v760_v32  ;;  %v773_v20 = vadd.f32 %v752_v26, %v661_v46  ;;  %v747_v56 = vpop.permute.xlu0 %746 }
 0x11a   : > { %790 = vst.msk [vmem:[%s1381_s18 + $0x78] sm:$0xff] %vm485_vm0, %v774_v39  ;;  %v772_v57 = vadd.f32 %v747_v56, %v660_v2 }
 0x11b   : > { %780 = vst.msk [vmem:[%s1381_s18 + $0x28] sm:$0xff] %vm485_vm0, %v764_v41 }
 0x11c   : > { %779 = vst.msk [vmem:[%s1381_s18 + $0x20] sm:$0xff] %vm485_vm0, %v763_v38 }
 0x11d   : > { %783 = vst.msk [vmem:[%s1381_s18 + $0x40] sm:$0xff] %vm485_vm0, %v767_v50 }
 0x11e   : > { %782 = vst.msk [vmem:[%s1381_s18 + $0x38] sm:$0xff] %vm485_vm0, %v766_v53 }
 0x11f   : > { %786 = vst.msk [vmem:[%s1381_s18 + $0x58] sm:$0xff] %vm485_vm0, %v770_v52 }
 0x120   : > { %785 = vst.msk [vmem:[%s1381_s18 + $0x50] sm:$0xff] %vm485_vm0, %v769_v6 }
 0x121   : > { %789 = vst.msk [vmem:[%s1381_s18 + $0x70] sm:$0xff] %vm485_vm0, %v773_v20 }
 0x122   : > { %788 = vst.msk [vmem:[%s1381_s18 + $0x68] sm:$0xff] %vm485_vm0, %v772_v57 }
 0x123 PF: > { %s15_s20 = sadd.s32 1, %s1002_s20   ;;  %s1450_s18 = smov %s998_s19 }
 0x124   : > { %p12_p5 = scmp.ge.s32.totalorder %s15_s20, 4   ;;  %s1451_s19 = smov %s1453_s21 }
 0x126   :  { %14 = sbr.rel (!%p12_p5) target bundleno = 2 (0x2), region = 73 }

// kernel: tpu_custom_call.1
= control target key start
LH: loop header
LB: loop body
LE: loop exit
PB: predicated region body
PF: predicated region fallthrough
CT: control target
= control target key end

     0   :  { %s1035_s18 = smov 0   ;;  %s1037_s19 = smov 0   ;;  %s1444_s0 = inlined_call_operand.vmem [shape: f32[2,128,64], index: 0, kind: input, shape index: {}]   ;;  %s1445_s1 = inlined_call_operand.vmem [shape: f32[2,128,1], index: 1, kind: input, shape index: {}]   ;;  %s1446_s2 = inlined_call_operand.vmem [shape: f32[128,128], index: 2, kind: input, shape index: {}]   ;;  %s1447_s3 = inlined_call_operand.vmem [shape: f32[128,1], index: 3, kind: input, shape index: {}]   ;;  %s1448_s4 = inlined_call_operand.vmem [shape: f32[128,1], index: 4, kind: input, shape index: {}]   ;;  %s1449_s5 = inlined_call_operand.vmem [shape: f32[2,128,64], index: 5, kind: output, shape index: {}]  }
   0x1   :  { %s1039_s20 = smov 0  }
   0x2 LB: > { %s27_s21 = sadd.s32 1, %s998_s19  ;;  %p890_p0 = scmp.ge.s32.totalorder %s1002_s20, 1  ;;  %s1002_s20 = sphi %s1039_s20, %s15_s20   ;;  %s998_s19 = sphi %s1037_s19, %s1451_s19   ;;  %s994_s18 = sphi %s1035_s18, %s1450_s18  }
   0x3   : > { %p29_p1 = scmp.ge.s32.totalorder %s27_s21, 2  ;;  %p216_p2 = scmp.lt.s32.totalorder %s1002_s20, 3 }
   0x5   : > { %s1453_s21 = smov (%p29_p1, %s27_s21), 0  ;;  %p217_p3 = pnand %p890_p0, %p216_p2 }
   0x6   : > { %p255_p4 = scmp.lt.s32.totalorder (!%p217_p3), %s994_s18, 1 }
   0x7   : > { %220 = sbr.rel (%p217_p3) target bundleno = 291 (0x123), region = 40 }
   0xc   : > { %v1004_v0 = vmov 0   ;;  %s1455_s18 = smov (!%p255_p4, %s994_s18), 1  ;;  %v292_v29 = vld [vmem:[%s1446_s2] sm:$0xff]  ;;  %v293_v36 = vld [vmem:[%s1446_s2 + $0x8] sm:$0xff]  ;;  %v294_v43 = vld [vmem:[%s1446_s2 + $0x10] sm:$0xff]  ;;  %vm485_vm0 = vcmask 523264  }
   0xd   : > { %977 = vset.pattern.permute.xlu2 %v1004_v0  ;;  %976 = vset.pattern.permute.xlu1 %v1004_v0  ;;  %s1053_s22 = sshll.u32 %s1455_s18, 7  ;;  %v296_v30 = vld [vmem:[%s1446_s2 + $0x20] sm:$0xff]  ;;  %v297_v37 = vld [vmem:[%s1446_s2 + $0x28] sm:$0xff]  ;;  %v298_v44 = vld [vmem:[%s1446_s2 + $0x30] sm:$0xff] }
   0xe   : > { %975 = vset.pattern.permute.xlu0 %v1004_v0  ;;  %s1059_s25 = scalar_lea.vmem %s1445_s1, %s1053_s22  ;;  %s1065_s28 = scalar_lea.vmem %s1444_s0, %s1053_s22  ;;  %v300_v31 = vld [vmem:[%s1446_s2 + $0x40] sm:$0xff]  ;;  %v301_v38 = vld [vmem:[%s1446_s2 + $0x48] sm:$0xff]  ;;  %v302_v45 = vld [vmem:[%s1446_s2 + $0x50] sm:$0xff] }
   0xf   : > { %v312_v1 = vld [vmem:[%s1059_s25 + $0x20] sm:$0xff]  ;;  %v310_v2 = vld [vmem:[%s1059_s25 + $0x10] sm:$0xff]  ;;  %v291_v4 = vld [vmem:[%s1065_s28 + $0x78] sm:$0xff]  ;;  %s1381_s18 = scalar_lea.vmem %s1449_s5, %s1053_s22 }
  0x10   : > { %v308_v3 = vld [vmem:[%s1059_s25] sm:$0xff]  ;;  %346 = vperm.xlu2 %977, %v312_v1   ;;  %336 = vperm.xlu1 %976, %v310_v2   ;;  %v290_v5 = vld [vmem:[%s1065_s28 + $0x70] sm:$0xff]  ;;  %v289_v6 = vld [vmem:[%s1065_s28 + $0x68] sm:$0xff] }
  0x11   : > { %326 = vperm.xlu0 %975, %v308_v3   ;;  %404 = vmatpush.msra.mxu0 %v291_v4  ;;  %v288_v7 = vld [vmem:[%s1065_s28 + $0x60] sm:$0xff]  ;;  %v313_v8 = vld [vmem:[%s1059_s25 + $0x28] sm:$0xff]  ;;  %v311_v9 = vld [vmem:[%s1059_s25 + $0x18] sm:$0xff] }
  0x12   : > { %902 = vmatpush.msra.mxu1 %v291_v4  ;;  %903 = vmatpush.msra.mxu2 %v291_v4  ;;  %v309_v10 = vld [vmem:[%s1059_s25 + $0x8] sm:$0xff]  ;;  %v287_v11 = vld [vmem:[%s1065_s28 + $0x58] sm:$0xff]  ;;  %v286_v12 = vld [vmem:[%s1065_s28 + $0x50] sm:$0xff] }
  0x13   : > { %904 = vmatpush.msra.mxu3 %v291_v4  ;;  %405 = vmatpush.msra.mxu0 %v290_v5  ;;  %v285_v13 = vld [vmem:[%s1065_s28 + $0x48] sm:$0xff]  ;;  %v284_v14 = vld [vmem:[%s1065_s28 + $0x40] sm:$0xff]  ;;  %v315_v16 = vld [vmem:[%s1059_s25 + $0x38] sm:$0xff] }
  0x14   : > { %905 = vmatpush.msra.mxu1 %v290_v5  ;;  %906 = vmatpush.msra.mxu2 %v290_v5  ;;  %v316_v15 = vld [vmem:[%s1059_s25 + $0x40] sm:$0xff]  ;;  %v314_v17 = vld [vmem:[%s1059_s25 + $0x30] sm:$0xff]  ;;  %v283_v18 = vld [vmem:[%s1065_s28 + $0x38] sm:$0xff] }
  0x15   : > { %907 = vmatpush.msra.mxu3 %v290_v5  ;;  %406 = vmatpush.msra.mxu0 %v289_v6  ;;  %v282_v19 = vld [vmem:[%s1065_s28 + $0x30] sm:$0xff]  ;;  %v281_v20 = vld [vmem:[%s1065_s28 + $0x28] sm:$0xff]  ;;  %v280_v21 = vld [vmem:[%s1065_s28 + $0x20] sm:$0xff] }
  0x16   : > { %908 = vmatpush.msra.mxu1 %v289_v6  ;;  %909 = vmatpush.msra.mxu2 %v289_v6  ;;  %v319_v22 = vld [vmem:[%s1059_s25 + $0x58] sm:$0xff]  ;;  %v318_v23 = vld [vmem:[%s1059_s25 + $0x50] sm:$0xff]  ;;  %v317_v24 = vld [vmem:[%s1059_s25 + $0x48] sm:$0xff] }
  0x17   : > { %910 = vmatpush.msra.mxu3 %v289_v6  ;;  %407 = vmatpush.msra.mxu0 %v288_v7  ;;  %v279_v25 = vld [vmem:[%s1065_s28 + $0x18] sm:$0xff]  ;;  %v278_v26 = vld [vmem:[%s1065_s28 + $0x10] sm:$0xff]  ;;  %v277_v27 = vld [vmem:[%s1065_s28 + $0x8] sm:$0xff] }
  0x18   : > { %911 = vmatpush.msra.mxu1 %v288_v7  ;;  %912 = vmatpush.msra.mxu2 %v288_v7  ;;  %v276_v28 = vld [vmem:[%s1065_s28] sm:$0xff]  ;;  %v322_v33 = vld [vmem:[%s1059_s25 + $0x70] sm:$0xff]  ;;  %v321_v34 = vld [vmem:[%s1059_s25 + $0x68] sm:$0xff] }
  0x19   : > { %913 = vmatpush.msra.mxu3 %v288_v7  ;;  %351 = vperm.xlu2 %977, %v313_v8   ;;  %v304_v32 = vld [vmem:[%s1446_s2 + $0x60] sm:$0xff]  ;;  %v305_v39 = vld [vmem:[%s1446_s2 + $0x68] sm:$0xff]  ;;  %v323_v42 = vld [vmem:[%s1059_s25 + $0x78] sm:$0xff] }
  0x1a   : > { %341 = vperm.xlu1 %976, %v311_v9   ;;  %331 = vperm.xlu0 %975, %v309_v10   ;;  %v320_v35 = vld [vmem:[%s1059_s25 + $0x60] sm:$0xff]  ;;  %v552_v40 = vld [vmem:[%s1447_s3 + $0x8] sm:$0xff]  ;;  %v306_v46 = vld [vmem:[%s1446_s2 + $0x70] sm:$0xff] }
  0x1b   : > { %408 = vmatpush.msra.mxu0 %v287_v11  ;;  %914 = vmatpush.msra.mxu1 %v287_v11  ;;  %v551_v41 = vld [vmem:[%s1447_s3] sm:$0xff]  ;;  %v554_v48 = vld [vmem:[%s1447_s3 + $0x18] sm:$0xff]  ;;  %v553_v49 = vld [vmem:[%s1447_s3 + $0x10] sm:$0xff] }
  0x1c   : > { %915 = vmatpush.msra.mxu2 %v287_v11  ;;  %916 = vmatpush.msra.mxu3 %v287_v11  ;;  %v555_v47 = vld [vmem:[%s1447_s3 + $0x20] sm:$0xff]  ;;  %v295_v50 = vld [vmem:[%s1446_s2 + $0x18] sm:$0xff]  ;;  %v557_v55 = vld [vmem:[%s1447_s3 + $0x30] sm:$0xff] }
  0x1d   : > { %409 = vmatpush.msra.mxu0 %v286_v12  ;;  %917 = vmatpush.msra.mxu1 %v286_v12  ;;  %v299_v51 = vld [vmem:[%s1446_s2 + $0x38] sm:$0xff]  ;;  %v556_v56 = vld [vmem:[%s1447_s3 + $0x28] sm:$0xff]  ;;  %v561_v57 = vld [vmem:[%s1447_s3 + $0x50] sm:$0xff] }
  0x1e   : > { %918 = vmatpush.msra.mxu2 %v286_v12  ;;  %919 = vmatpush.msra.mxu3 %v286_v12  ;;  %v303_v52 = vld [vmem:[%s1446_s2 + $0x58] sm:$0xff]  ;;  %v560_v58 = vld [vmem:[%s1447_s3 + $0x48] sm:$0xff]  ;;  %v559_v59 = vld [vmem:[%s1447_s3 + $0x40] sm:$0xff] }
  0x1f   : > { %410 = vmatpush.msra.mxu0 %v285_v13  ;;  %920 = vmatpush.msra.mxu1 %v285_v13  ;;  %v307_v53 = vld [vmem:[%s1446_s2 + $0x78] sm:$0xff]  ;;  %v564_v60 = vld [vmem:[%s1447_s3 + $0x68] sm:$0xff]  ;;  %v563_v61 = vld [vmem:[%s1447_s3 + $0x60] sm:$0xff] }
  0x20   : > { %921 = vmatpush.msra.mxu2 %v285_v13  ;;  %922 = vmatpush.msra.mxu3 %v285_v13  ;;  %v558_v54 = vld [vmem:[%s1447_s3 + $0x38] sm:$0xff]  ;;  %v663_v63 = vld [vmem:[%s1448_s4] sm:$0xff]  ;;  %v565_v1 = vld [vmem:[%s1447_s3 + $0x70] sm:$0xff] }
  0x21   : > { %411 = vmatpush.msra.mxu0 %v284_v14  ;;  %923 = vmatpush.msra.mxu1 %v284_v14  ;;  %v562_v62 = vld [vmem:[%s1447_s3 + $0x58] sm:$0xff]  ;;  %v665_v3 = vld [vmem:[%s1448_s4 + $0x10] sm:$0xff]  ;;  %v664_v4 = vld [vmem:[%s1448_s4 + $0x8] sm:$0xff] }
  0x22   : > { %924 = vmatpush.msra.mxu2 %v284_v14  ;;  %925 = vmatpush.msra.mxu3 %v284_v14  ;;  %v566_v0 = vld [vmem:[%s1447_s3 + $0x78] sm:$0xff]  ;;  %v669_v5 = vld [vmem:[%s1448_s4 + $0x30] sm:$0xff]  ;;  %v668_v6 = vld [vmem:[%s1448_s4 + $0x28] sm:$0xff] }
  0x23   : > { %366 = vperm.xlu2 %977, %v316_v15   ;;  %361 = vperm.xlu1 %976, %v315_v16   ;;  %v666_v2 = vld [vmem:[%s1448_s4 + $0x18] sm:$0xff]  ;;  %v667_v7 = vld [vmem:[%s1448_s4 + $0x20] sm:$0xff]  ;;  %v672_v8 = vld [vmem:[%s1448_s4 + $0x48] sm:$0xff] }
  0x24   : > { %356 = vperm.xlu0 %975, %v314_v17   ;;  %412 = vmatpush.msra.mxu0 %v283_v18  ;;  %v671_v9 = vld [vmem:[%s1448_s4 + $0x40] sm:$0xff]  ;;  %v670_v10 = vld [vmem:[%s1448_s4 + $0x38] sm:$0xff]  ;;  %v673_v14 = vld [vmem:[%s1448_s4 + $0x50] sm:$0xff] }
  0x25   : > { %926 = vmatpush.msra.mxu1 %v283_v18  ;;  %927 = vmatpush.msra.mxu2 %v283_v18  ;;  %v675_v12 = vld [vmem:[%s1448_s4 + $0x60] sm:$0xff]  ;;  %v674_v13 = vld [vmem:[%s1448_s4 + $0x58] sm:$0xff] }
  0x26   : > { %928 = vmatpush.msra.mxu3 %v283_v18  ;;  %413 = vmatpush.msra.mxu0 %v282_v19  ;;  %v678_v18 = vld [vmem:[%s1448_s4 + $0x78] sm:$0xff] }
  0x27   : > { %929 = vmatpush.msra.mxu1 %v282_v19  ;;  %930 = vmatpush.msra.mxu2 %v282_v19 }
  0x28   : > { %931 = vmatpush.msra.mxu3 %v282_v19  ;;  %414 = vmatpush.msra.mxu0 %v281_v20  ;;  %v677_v19 = vld [vmem:[%s1448_s4 + $0x70] sm:$0xff] }
  0x29   : > { %932 = vmatpush.msra.mxu1 %v281_v20  ;;  %933 = vmatpush.msra.mxu2 %v281_v20 }
  0x2a   : > { %934 = vmatpush.msra.mxu3 %v281_v20  ;;  %415 = vmatpush.msra.mxu0 %v280_v21  ;;  %v676_v20 = vld [vmem:[%s1448_s4 + $0x68] sm:$0xff] }
  0x2b   : > { %935 = vmatpush.msra.mxu1 %v280_v21  ;;  %936 = vmatpush.msra.mxu2 %v280_v21 }
  0x2c   : > { %937 = vmatpush.msra.mxu3 %v280_v21  ;;  %381 = vperm.xlu2 %977, %v319_v22  }
  0x2d   : > { %376 = vperm.xlu1 %976, %v318_v23   ;;  %371 = vperm.xlu0 %975, %v317_v24  }
  0x2e   : > { %416 = vmatpush.msra.mxu0 %v279_v25  ;;  %938 = vmatpush.msra.mxu1 %v279_v25 }
  0x2f   : > { %939 = vmatpush.msra.mxu2 %v279_v25  ;;  %940 = vmatpush.msra.mxu3 %v279_v25 }
  0x30   : > { %417 = vmatpush.msra.mxu0 %v278_v26  ;;  %941 = vmatpush.msra.mxu1 %v278_v26 }
  0x31   : > { %942 = vmatpush.msra.mxu2 %v278_v26  ;;  %943 = vmatpush.msra.mxu3 %v278_v26 }
  0x32   : > { %418 = vmatpush.msra.mxu0 %v277_v27  ;;  %944 = vmatpush.msra.mxu1 %v277_v27 }
  0x33   : > { %945 = vmatpush.msra.mxu2 %v277_v27  ;;  %946 = vmatpush.msra.mxu3 %v277_v27 }
  0x34   : > { %419 = vmatpush.msra.mxu0 %v276_v28  ;;  %947 = vmatpush.msra.mxu1 %v276_v28 }
  0x35   : > { %948 = vmatpush.msra.mxu2 %v276_v28  ;;  %949 = vmatpush.msra.mxu3 %v276_v28 }
  0x36   : > { %420 = vmatmul.f32.vlgmr.msra.gmra.mxu0 %v292_v29  ;;  %432 = vmatmul.f32.vlgmr.msra.gmra.mxu1 %v296_v30 }
  0x37   : > { %444 = vmatmul.f32.vlgmr.msra.gmra.mxu2 %v300_v31  ;;  %456 = vmatmul.f32.vlgmr.msra.gmra.mxu3 %v304_v32 }
  0x38   : > { %396 = vperm.xlu2 %977, %v322_v33   ;;  %391 = vperm.xlu1 %976, %v321_v34  }
  0x39   : > { %386 = vperm.xlu0 %975, %v320_v35  }
  0x3e   : > { %423 = vmatmul.f32.gmra.mxu0 %v293_v36  ;;  %435 = vmatmul.f32.gmra.mxu1 %v297_v37 }
  0x3f   : > { %447 = vmatmul.f32.gmra.mxu2 %v301_v38  ;;  %459 = vmatmul.f32.gmra.mxu3 %v305_v39 }
  0x40   : > { %574 = vperm.xlu2 %977, %v552_v40   ;;  %569 = vperm.xlu1 %976, %v551_v41  }
  0x41   : > { %401 = vperm.xlu0 %975, %v323_v42  }
  0x46   : > { %426 = vmatmul.f32.gmra.mxu0 %v294_v43  ;;  %438 = vmatmul.f32.gmra.mxu1 %v298_v44 }
  0x47   : > { %450 = vmatmul.f32.gmra.mxu2 %v302_v45  ;;  %462 = vmatmul.f32.gmra.mxu3 %v306_v46 }
  0x48   : > { %589 = vperm.xlu2 %977, %v555_v47   ;;  %584 = vperm.xlu1 %976, %v554_v48  }
  0x49   : > { %579 = vperm.xlu0 %975, %v553_v49  }
  0x4e   : > { %429 = vmatmul.f32.gmra.mxu0 %v295_v50  ;;  %441 = vmatmul.f32.gmra.mxu1 %v299_v51 }
  0x4f   : > { %453 = vmatmul.f32.gmra.mxu2 %v303_v52  ;;  %465 = vmatmul.f32.gmra.mxu3 %v307_v53 }
  0x50   : > { %604 = vperm.xlu2 %977, %v558_v54   ;;  %599 = vperm.xlu1 %976, %v557_v55  }
  0x51   : > { %594 = vperm.xlu0 %975, %v556_v56  }
  0x58   : > { %619 = vperm.xlu2 %977, %v561_v57   ;;  %614 = vperm.xlu1 %976, %v560_v58  }
  0x59   : > { %609 = vperm.xlu0 %975, %v559_v59  }
  0x60   : > { %634 = vperm.xlu2 %977, %v564_v60   ;;  %629 = vperm.xlu1 %976, %v563_v61  }
  0x61   : > { %624 = vperm.xlu0 %975, %v562_v62  }
  0x68   : > { %681 = vperm.xlu2 %977, %v663_v63   ;;  %644 = vperm.xlu1 %976, %v566_v0  }
  0x69   : > { %639 = vperm.xlu0 %975, %v565_v1  }
  0x6a   : > { %v347_v11 = vpop.permute.xlu2 %346 }
  0x70   : > { %696 = vperm.xlu2 %977, %v666_v2   ;;  %691 = vperm.xlu1 %976, %v665_v3  }
  0x71   : > { %686 = vperm.xlu0 %975, %v664_v4  }
  0x73   : > { %v352_v17 = vpop.permute.xlu2 %351 }
  0x78   : > { %711 = vperm.xlu2 %977, %v669_v5   ;;  %706 = vperm.xlu1 %976, %v668_v6  }
  0x79   : > { %701 = vperm.xlu0 %975, %v667_v7  }
  0x7d   : > { %v367_v23 = vpop.permute.xlu2 %366 }
  0x80   : > { %726 = vperm.xlu2 %977, %v672_v8   ;;  %721 = vperm.xlu1 %976, %v671_v9  }
  0x81   : > { %716 = vperm.xlu0 %975, %v670_v10  }
  0x82   : > { %v337_v15 = vpop.permute.xlu1 %336 }
  0x83   : > { %v327_v16 = vpop.permute.xlu0 %326 }
  0x86   : > { %v1243_v26 = vpop.permute.xlu2 %381 }
  0x88   : > { %741 = vperm.xlu2 %977, %v675_v12   ;;  %736 = vperm.xlu1 %976, %v674_v13  }
  0x89   : > { %731 = vperm.xlu0 %975, %v673_v14  }
  0x8c   : > { %v342_v21 = vpop.permute.xlu1 %341  ;;  %v332_v22 = vpop.permute.xlu0 %331 }
  0x90   : > { %756 = vperm.xlu2 %977, %v678_v18   ;;  %751 = vperm.xlu1 %976, %v677_v19  }
  0x91   : > { %746 = vperm.xlu0 %975, %v676_v20  }
  0x92   : > { %v1247_v29 = vpop.permute.xlu2 %396 }
  0x95   : > { %v362_v24 = vpop.permute.xlu1 %361 }
  0x96   : > { %v357_v25 = vpop.permute.xlu0 %356 }
  0x9a   : > { %v1253_v32 = vpop.permute.xlu2 %574 }
  0x9f   : > { %v1245_v27 = vpop.permute.xlu1 %376  ;;  %v372_v28 = vpop.permute.xlu0 %371 }
  0xa2   : > { %v1259_v38 = vpop.permute.xlu2 %589 }
  0xaa   : > { %v1249_v30 = vpop.permute.xlu1 %391  ;;  %v1271_v50 = vpop.permute.xlu2 %604 }
  0xab   : > { %v1251_v31 = vpop.permute.xlu0 %386 }
  0xb2   : > { %v1255_v35 = vpop.permute.xlu1 %569  ;;  %v1298_v6 = vpop.permute.xlu2 %619 }
  0xb3   : > { %v421_v33 = vpop.f32.mrf.mxu0  ;;  %v433_v34 = vpop.f32.mrf.mxu1 }
  0xb4   : > { %v1257_v36 = vpop.permute.xlu0 %401  ;;  %v1267_v47 = vadd.f32 %v421_v33, %v327_v16  ;;  %v1279_v55 = vadd.f32 %v433_v34, %v347_v11 }
  0xb6   : > { %v469_v52 = vmul.f32 %v1267_v47, %v1267_v47  ;;  %v473_v3 = vmul.f32 %v1279_v55, %v1279_v55 }
  0xb8   : > { %v486_v59 = vsel %vm485_vm0, %v469_v52, 0.0  ;;  %v493_v12 = vsel %vm485_vm0, %v473_v3, 0.0 }
  0xba   : > { %v445_v37 = vpop.f32.mrf.mxu2  ;;  %v457_v41 = vpop.f32.mrf.mxu3 }
  0xbb   : > { %v424_v39 = vpop.f32.mrf.mxu0  ;;  %v436_v40 = vpop.f32.mrf.mxu1  ;;  %v1306_v13 = vadd.f32 %v445_v37, %v367_v23 }
  0xbc   : > { %v1261_v42 = vpop.permute.xlu1 %584  ;;  %v1263_v43 = vadd.f32 %v424_v39, %v332_v22  ;;  %v1265_v45 = vpop.permute.xlu0 %579  ;;  %v1283_v60 = vadd.f32 %v436_v40, %v352_v17 }
  0xbd   : > { %v477_v22 = vmul.f32 %v1306_v13, %v1306_v13  ;;  %v1331_v40 = vpop.permute.xlu2 %634 }
  0xbe   : > { %v470_v51 = vmul.f32 %v1263_v43, %v1263_v43  ;;  %v474_v8 = vmul.f32 %v1283_v60, %v1283_v60 }
  0xc0   : > { %v487_v56 = vsel %vm485_vm0, %v470_v51, 0.0  ;;  %v495_v17 = vsel %vm485_vm0, %v474_v8, 0.0 }
  0xc1   : > { %v488_v0 = vadd.f32 %v487_v56, %v486_v59 }
  0xc2   : > { %v448_v44 = vpop.f32.mrf.mxu2  ;;  %v460_v54 = vpop.f32.mrf.mxu3 }
  0xc3   : > { %v427_v46 = vpop.f32.mrf.mxu0  ;;  %v439_v49 = vpop.f32.mrf.mxu1  ;;  %v1311_v18 = vadd.f32 %v448_v44, %v372_v28 }
  0xc4   : > { %v1269_v48 = vadd.f32 %v427_v46, %v337_v15  ;;  %v1285_v61 = vpop.permute.xlu1 %599  ;;  %v1290_v1 = vpop.permute.xlu0 %594  ;;  %v1294_v4 = vadd.f32 %v439_v49, %v357_v25  ;;  %v501_v46 = vsel %vm485_vm0, %v477_v22, 0.0  ;;  %v1335_v49 = vadd.f32 %v457_v41, %v1251_v31 }
  0xc5   : > { %v478_v28 = vmul.f32 %v1311_v18, %v1311_v18  ;;  %v682_v8 = vpop.permute.xlu2 %681 }
  0xc6   : > { %v471_v53 = vmul.f32 %v1269_v48, %v1269_v48  ;;  %v475_v14 = vmul.f32 %v1294_v4, %v1294_v4 }
  0xc7   : > { %v503_v52 = vsel %vm485_vm0, %v478_v28, 0.0 }
  0xc8   : > { %v489_v62 = vsel %vm485_vm0, %v471_v53, 0.0  ;;  %v497_v23 = vsel %vm485_vm0, %v475_v14, 0.0  ;;  %v1341_v53 = vadd.f32 %v460_v54, %v1249_v30 }
  0xc9   : > { %v490_v7 = vadd.f32 %v489_v62, %v488_v0 }
  0xca   : > { %v451_v57 = vpop.f32.mrf.mxu2  ;;  %v463_v15 = vpop.f32.mrf.mxu3  ;;  %v482_v62 = vmul.f32 %v1341_v53, %v1341_v53 }
  0xcb   : > { %v430_v58 = vpop.f32.mrf.mxu0  ;;  %v442_v2 = vpop.f32.mrf.mxu1  ;;  %v1321_v25 = vadd.f32 %v451_v57, %v1245_v27  ;;  %v1349_v41 = vadd.f32 %v463_v15, %v1247_v29 }
  0xcc   : > { %v1288_v63 = vadd.f32 %v430_v58, %v342_v21  ;;  %v1303_v10 = vadd.f32 %v442_v2, %v362_v24  ;;  %v1318_v24 = vpop.permute.xlu1 %614  ;;  %v1323_v33 = vpop.permute.xlu0 %609  ;;  %v481_v58 = vmul.f32 %v1335_v49, %v1335_v49 }
  0xcd   : > { %v479_v27 = vmul.f32 %v1321_v25, %v1321_v25 }
  0xce   : > { %v472_v5 = vmul.f32 %v1288_v63, %v1288_v63  ;;  %v476_v19 = vmul.f32 %v1303_v10, %v1303_v10 }
  0xcf   : > { %v505_v31 = vsel %vm485_vm0, %v479_v27, 0.0 }
  0xd0   : > { %v491_v9 = vsel %vm485_vm0, %v472_v5, 0.0  ;;  %v499_v37 = vsel %vm485_vm0, %v476_v19, 0.0  ;;  %v509_v5 = vsel %vm485_vm0, %v481_v58, 0.0 }
  0xd1   : > { %v492_v11 = vadd.f32 %v491_v9, %v490_v7  ;;  %v483_v7 = vmul.f32 %v1349_v41, %v1349_v41  ;;  %v511_v9 = vsel %vm485_vm0, %v482_v62, 0.0 }
  0xd2   : > { %v454_v21 = vpop.f32.mrf.mxu2  ;;  %v466_v57 = vpop.f32.mrf.mxu3 }
  0xd3   : > { %v494_v16 = vadd.f32 %v493_v12, %v492_v11  ;;  %v1329_v39 = vadd.f32 %v454_v21, %v1243_v26  ;;  %v467_v54 = vadd.f32 %v466_v57, %v1257_v36  ;;  %v513_v14 = vsel %vm485_vm0, %v483_v7, 0.0  ;;  %v697_v21 = vpop.permute.xlu2 %696 }
  0xd4   : > { %v630_v0 = vpop.permute.xlu1 %629  ;;  %v1355_v2 = vpop.permute.xlu0 %624 }
  0xd5   : > { %v496_v20 = vadd.f32 %v495_v17, %v494_v16  ;;  %v480_v26 = vmul.f32 %v1329_v39, %v1329_v39  ;;  %v484_v11 = vmul.f32 %v467_v54, %v467_v54 }
  0xd7   : > { %v498_v34 = vadd.f32 %v497_v23, %v496_v20  ;;  %v507_v30 = vsel %vm485_vm0, %v480_v26, 0.0  ;;  %v515_v16 = vsel %vm485_vm0, %v484_v11, 0.0 }
  0xd9   : > { %v500_v44 = vadd.f32 %v499_v37, %v498_v34 }
  0xdb   : > { %v502_v51 = vadd.f32 %v501_v46, %v500_v44  ;;  %v712_v27 = vpop.permute.xlu2 %711 }
  0xdc   : > { %v645_v17 = vpop.permute.xlu1 %644  ;;  %v1363_v20 = vpop.permute.xlu0 %639 }
  0xdd   : > { %v504_v56 = vadd.f32 %v503_v52, %v502_v51 }
  0xdf   : > { %v506_v59 = vadd.f32 %v505_v31, %v504_v56 }
  0xe1   : > { %v508_v3 = vadd.f32 %v507_v30, %v506_v59 }
  0xe3   : > { %v510_v29 = vadd.f32 %v509_v5, %v508_v3  ;;  %v727_v58 = vpop.permute.xlu2 %726 }
  0xe4   : > { %v692_v37 = vpop.permute.xlu1 %691  ;;  %v687_v46 = vpop.permute.xlu0 %686 }
  0xe5   : > { %v512_v12 = vadd.f32 %v511_v9, %v510_v29 }
  0xe7   : > { %v514_v15 = vadd.f32 %v513_v14, %v512_v12 }
  0xe9   : > { %v516_v36 = vadd.f32 %v515_v16, %v514_v15 }
  0xeb   : > { %v517_v19 = vrot.slane %v516_v36, 4  ;;  %v742_v29 = vpop.permute.xlu2 %741 }
  0xec   : > { %v707_v26 = vpop.permute.xlu1 %706  ;;  %v1365_v56 = vpop.permute.xlu0 %701 }
  0xed   : > { %v518_v22 = vadd.f32 %v517_v19, %v516_v36 }
  0xef   : > { %v519_v23 = vrot.slane %v518_v22, 2 }
  0xf1   : > { %v520_v34 = vadd.f32 %v519_v23, %v518_v22 }
  0xf3   : > { %v521_v28 = vrot.slane %v520_v34, 1 }
  0xf4   : > { %v722_v3 = vpop.permute.xlu1 %721  ;;  %v717_v5 = vpop.permute.xlu0 %716 }
  0xf5   : > { %v522_v44 = vadd.f32 %v521_v28, %v520_v34 }
  0xf7   : > { %v523_v51 = vmul.f32 0.0078125, %v522_v44 }
  0xf9   : > { %v524_v52 = vadd.f32 1e-06, %v523_v51 }
  0xfb   : > { %978 = vrsqrt.f32 %v524_v52  ;;  %vm531_vm2 = vweird.f32 %v524_v52 }
 0x101   : > { %v979_v57 = vpop.eup %978 }
 0x102   : > { %v526_v31 = vmul.f32 %v979_v57, %v524_v52  ;;  %vm532_vm1 = vweird.f32 %v979_v57 }
 0x103   : > { %vm533_vm3 = vmor %vm531_vm2, %vm532_vm1 }
 0x104   : > { %v527_v59 = vmul.f32 %v979_v57, %v526_v31 }
 0x106   : > { %v528_v62 = vmul.f32 0.5, %v527_v59 }
 0x108   : > { %v529_v30 = vsub.f32 1.5, %v528_v62 }
 0x10a   : > { %v530_v7 = vmul.f32 %v979_v57, %v529_v30 }
 0x10c   : > { %v534_v9 = vsel %vm533_vm3, %v979_v57, %v530_v7 }
 0x10d   : > { %v535_v11 = vmul.f32 %v534_v9, %v1267_v47  ;;  %v538_v12 = vmul.f32 %v534_v9, %v1288_v63  ;;  %v541_v14 = vmul.f32 %v534_v9, %v1294_v4  ;;  %v544_v15 = vmul.f32 %v534_v9, %v1311_v18 }
 0x10e   : > { %v550_v16 = vmul.f32 %v534_v9, %v467_v54  ;;  %v547_v36 = vmul.f32 %v534_v9, %v1335_v49  ;;  %v537_v19 = vmul.f32 %v534_v9, %v1269_v48  ;;  %v540_v54 = vmul.f32 %v534_v9, %v1283_v60  ;;  %v757_v60 = vpop.permute.xlu2 %756 }
 0x10f   : > { %v647_v22 = vmul.f32 %v1255_v35, %v535_v11  ;;  %v650_v23 = vmul.f32 %v1261_v42, %v538_v12  ;;  %v653_v34 = vmul.f32 %v1285_v61, %v541_v14  ;;  %v656_v28 = vmul.f32 %v1318_v24, %v544_v15  ;;  %v737_v24 = vpop.permute.xlu1 %736 }
 0x110   : > { %v659_v47 = vmul.f32 %v630_v0, %v547_v36  ;;  %v649_v63 = vmul.f32 %v1265_v45, %v537_v19  ;;  %v662_v42 = vmul.f32 %v645_v17, %v550_v16  ;;  %v536_v61 = vmul.f32 %v534_v9, %v1263_v43 }
 0x111   : > { %v759_v4 = vadd.f32 %v682_v8, %v647_v22  ;;  %v762_v48 = vadd.f32 %v697_v21, %v650_v23  ;;  %v765_v18 = vadd.f32 %v712_v27, %v653_v34  ;;  %v768_v35 = vadd.f32 %v727_v58, %v656_v28  ;;  %v732_v8 = vpop.permute.xlu0 %731 }
 0x112   : > { %v771_v49 = vadd.f32 %v742_v29, %v659_v47  ;;  %v539_v0 = vmul.f32 %v534_v9, %v1279_v55  ;;  %v543_v44 = vmul.f32 %v534_v9, %v1306_v13  ;;  %v542_v45 = vmul.f32 %v534_v9, %v1303_v10 }
 0x113   : > { %775 = vst.msk [vmem:[%s1381_s18] sm:$0xff] %vm485_vm0, %v759_v4  ;;  %v761_v17 = vadd.f32 %v692_v37, %v649_v63  ;;  %v648_v21 = vmul.f32 %v1253_v32, %v536_v61  ;;  %v546_v43 = vmul.f32 %v534_v9, %v1329_v39  ;;  %v545_v27 = vmul.f32 %v534_v9, %v1321_v25 }
 0x114   : > { %778 = vst.msk [vmem:[%s1381_s18 + $0x18] sm:$0xff] %vm485_vm0, %v762_v48  ;;  %v549_v55 = vmul.f32 %v534_v9, %v1349_v41  ;;  %v652_v10 = vmul.f32 %v1290_v1, %v540_v54  ;;  %v651_v13 = vmul.f32 %v1259_v38, %v539_v0  ;;  %v655_v37 = vmul.f32 %v1323_v33, %v543_v44 }
 0x115   : > { %781 = vst.msk [vmem:[%s1381_s18 + $0x30] sm:$0xff] %vm485_vm0, %v765_v18  ;;  %v760_v32 = vadd.f32 %v687_v46, %v648_v21  ;;  %v774_v39 = vadd.f32 %v757_v60, %v662_v42  ;;  %v654_v25 = vmul.f32 %v1271_v50, %v542_v45  ;;  %v548_v51 = vmul.f32 %v534_v9, %v1341_v53 }
 0x116   : > { %784 = vst.msk [vmem:[%s1381_s18 + $0x48] sm:$0xff] %vm485_vm0, %v768_v35  ;;  %v764_v41 = vadd.f32 %v707_v26, %v652_v10  ;;  %v658_v1 = vmul.f32 %v1355_v2, %v546_v43  ;;  %v763_v38 = vadd.f32 %v1365_v56, %v651_v13  ;;  %v657_v33 = vmul.f32 %v1298_v6, %v545_v27 }
 0x117   : > { %787 = vst.msk [vmem:[%s1381_s18 + $0x60] sm:$0xff] %vm485_vm0, %v771_v49  ;;  %v661_v46 = vmul.f32 %v1363_v20, %v549_v55  ;;  %v767_v50 = vadd.f32 %v722_v3, %v655_v37  ;;  %v766_v53 = vadd.f32 %v717_v5, %v654_v25  ;;  %v660_v2 = vmul.f32 %v1331_v40, %v548_v51  ;;  %v752_v26 = vpop.permute.xlu1 %751 }
 0x118   : > { %777 = vst.msk [vmem:[%s1381_s18 + $0x10] sm:$0xff] %vm485_vm0, %v761_v17  ;;  %v770_v52 = vadd.f32 %v737_v24, %v658_v1  ;;  %v769_v6 = vadd.f32 %v732_v8, %v657_v33 }
 0x119   : > { %776 = vst.msk [vmem:[%s1381_s18 + $0x8] sm:$0xff] %vm485_vm0, %v760_v32  ;;  %v773_v20 = vadd.f32 %v752_v26, %v661_v46  ;;  %v747_v56 = vpop.permute.xlu0 %746 }
 0x11a   : > { %790 = vst.msk [vmem:[%s1381_s18 + $0x78] sm:$0xff] %vm485_vm0, %v774_v39  ;;  %v772_v57 = vadd.f32 %v747_v56, %v660_v2 }
 0x11b   : > { %780 = vst.msk [vmem:[%s1381_s18 + $0x28] sm:$0xff] %vm485_vm0, %v764_v41 }
 0x11c   : > { %779 = vst.msk [vmem:[%s1381_s18 + $0x20] sm:$0xff] %vm485_vm0, %v763_v38 }
 0x11d   : > { %783 = vst.msk [vmem:[%s1381_s18 + $0x40] sm:$0xff] %vm485_vm0, %v767_v50 }
 0x11e   : > { %782 = vst.msk [vmem:[%s1381_s18 + $0x38] sm:$0xff] %vm485_vm0, %v766_v53 }
 0x11f   : > { %786 = vst.msk [vmem:[%s1381_s18 + $0x58] sm:$0xff] %vm485_vm0, %v770_v52 }
 0x120   : > { %785 = vst.msk [vmem:[%s1381_s18 + $0x50] sm:$0xff] %vm485_vm0, %v769_v6 }
 0x121   : > { %789 = vst.msk [vmem:[%s1381_s18 + $0x70] sm:$0xff] %vm485_vm0, %v773_v20 }
 0x122   : > { %788 = vst.msk [vmem:[%s1381_s18 + $0x68] sm:$0xff] %vm485_vm0, %v772_v57 }
 0x123 PF: > { %s15_s20 = sadd.s32 1, %s1002_s20   ;;  %s1450_s18 = smov %s998_s19 }
 0x124   : > { %p12_p5 = scmp.ge.s32.totalorder %s15_s20, 4   ;;  %s1451_s19 = smov %s1453_s21 }
 0x126   :  { %14 = sbr.rel (!%p12_p5) target bundleno = 2 (0x2), region = 73 }

</bundles_post_ra>
